<compile_context>
chip_gen: v6e
topology: v6e:2x2x1
jax: 0.10.0
libtpu: 0.0.40
codegen_flags: <defaults>
</compile_context>

<pallas_src>
import functools

import jax
import jax.numpy as jnp
from jax import lax
from jax.experimental import pallas as pl
from jax.experimental.pallas import tpu as pltpu

HIDDEN = 32
INPUT = 1
OUTPUT = 1
SUBLANES = 8  # pad batch up to this many sublanes

# MXU input dtype for the per-step recurrent matmul.  jnp.bfloat16 roughly
# halves-to-thirds the per-step MXU latency on v6e/v7x but loosens accuracy;
# keep f32 (precision pinned HIGHEST) so the forward matches the f32 PyTorch
# semantics to 1e-5.
MATMUL_DTYPE = jnp.float32


def _num_streams(bp):
    # Two independent batch streams once the padded batch has >= 2 sublane
    # groups (so each chunk stays a multiple of 8 rows); otherwise one.
    return 2 if (bp >= 2 * SUBLANES and bp % (2 * SUBLANES) == 0) else 1


def _rnn_kernel(x_ref,      # (T, Bp, 1) f32  -- time-major input
                h0_ref,     # (Bp, H)    f32  -- initial hidden state
                wih_ref,    # (1, H)     f32  -- W_ih^T (I == 1 -> one row)
                whhT_ref,   # (H, H)     f32  -- W_hh^T
                b_ref,      # (1, H)     f32  -- b_ih + b_hh
                wout_ref,   # (1, H)     f32  -- Linear(32, 1) weight row
                bout_ref,   # (1, 1)     f32  -- Linear(32, 1) bias
                y_ref,      # (T, Bp)    f32  -- per-step linear output
                hf_ref,     # (Bp, H)    f32  -- final hidden state
                h_scr):     # (T, Bp, H) f32  scratch, reused: pre_x -> h_t
    T = x_ref.shape[0]
    Bp = h0_ref.shape[0]
    ns = _num_streams(Bp)
    chunk = Bp // ns

    # Loop-invariant recurrent weight: loaded/cast once before the unrolled
    # loop so the MXU RHS stays resident across steps.
    # TODO(synk): if a bundle dump shows Mosaic re-pushing the RHS each step,
    # force residency with pltpu.matmul_push_rhs / matmul_acc_lhs / matmul_pop.
    whhT = whhT_ref[...].astype(MATMUL_DTYPE)

    # --- Hoisted input contribution (pure VPU, one pass, no per-step bias) ---
    # pre_x[t, b, :] = x[t, b, 0] * w_ih[:, 0] + (b_ih + b_hh)
    # x arrives as (T, Bp, 1) so this is a cheap 1 -> H lane broadcast (no
    # in-kernel lane->sublane relayout).
    h_scr[...] = (x_ref[...] * wih_ref[...][None, :, :]
                  + b_ref[...][None, :, :])

    # --- Serial recurrence: per step, per stream: one (chunk,H)@(H,H) MXU
    # matmul + one EUP tanh.  pre_x[t] is consumed then overwritten with h_t.
    def body(t, carry):
        pre = h_scr[t]                                       # (Bp, H)
        new = []
        for s in range(ns):                                  # independent streams
            acc = jnp.dot(carry[s].astype(MATMUL_DTYPE), whhT,
                          preferred_element_type=jnp.float32,
                          precision=jax.lax.Precision.HIGHEST)
            new.append(jnp.tanh(pre[s * chunk:(s + 1) * chunk] + acc))
        h_scr[t] = new[0] if ns == 1 else jnp.concatenate(new, axis=0)
        return tuple(new)

    h0 = h0_ref[...]
    carry0 = tuple(h0[s * chunk:(s + 1) * chunk] for s in range(ns))
    carry = lax.fori_loop(0, T, body, carry0, unroll=True)
    hf_ref[...] = carry[0] if ns == 1 else jnp.concatenate(carry, axis=0)

    # --- Hoisted output projection: Linear(32, 1) over all steps at once as a
    # single lane reduction -> one dense (T, Bp) slab, no per-step single-lane
    # masked stores.
    hall = h_scr[...]                                        # (T, Bp, H) = all h_t
    y_ref[...] = (jnp.sum(hall * wout_ref[...][None, :, :], axis=-1)
                  + bout_ref[...])                           # (T, Bp)


@functools.partial(jax.jit, static_argnames=())
def rnn_forward(x, h_state, params):
    """x: (B, T, 1) f32, h_state: (1, B, H) f32 (zeros == PyTorch None init)."""
    B, T, I = x.shape
    assert I == INPUT
    H = HIDDEN

    w_ih, w_hh, b_ih, b_hh, w_out, b_out = (
        params["w_ih"], params["w_hh"], params["b_ih"],
        params["b_hh"], params["w_out"], params["b_out"])

    # Pad batch up to a sublane multiple so the (B, H) working set fills vregs.
    Bp = max(SUBLANES, ((B + SUBLANES - 1) // SUBLANES) * SUBLANES)

    # Glue: layout / transpose prep (plain JAX, free layout plumbing).
    x_tb = jnp.transpose(x[:, :, 0].astype(jnp.float32), (1, 0))   # (T, B)
    x_tb = jnp.pad(x_tb, ((0, 0), (0, Bp - B)))[..., None]         # (T, Bp, 1)
    h0 = h_state[0].astype(jnp.float32)                            # (B, H)
    h0 = jnp.pad(h0, ((0, Bp - B), (0, 0)))                        # (Bp, H)

    wih_row = w_ih.T.astype(jnp.float32)                  # (1, H)
    whhT = w_hh.T.astype(jnp.float32)                     # (H, H)
    b = (b_ih + b_hh).reshape(1, H).astype(jnp.float32)   # (1, H)
    wout_row = w_out.reshape(1, H).astype(jnp.float32)    # (1, H)
    bout = b_out.reshape(1, 1).astype(jnp.float32)        # (1, 1)

    vmem = pl.BlockSpec(memory_space=pltpu.MemorySpace.VMEM)
    y_tb, hf = pl.pallas_call(
        _rnn_kernel,
        out_shape=(jax.ShapeDtypeStruct((T, Bp), jnp.float32),
                   jax.ShapeDtypeStruct((Bp, H), jnp.float32)),
        in_specs=[vmem] * 7,
        out_specs=(vmem, vmem),
        # Single reused scratch: pre_x -> h_t (half the VMEM of two buffers).
        scratch_shapes=[pltpu.VMEM((T, Bp, H), jnp.float32)],
    )(x_tb, h0, wih_row, whhT, b, wout_row, bout)

    y = jnp.transpose(y_tb, (1, 0))[:B][:, :, None]   # (B, T, 1)
    h_out = hf[:B][None, :, :]                        # (1, B, H)
    return y, h_out


def init_params(key):
    """Deterministic params, PyTorch-style uniform(-1/sqrt(H), 1/sqrt(H))."""
    H = HIDDEN
    k = 1.0 / jnp.sqrt(jnp.float32(H))
    keys = jax.random.split(key, 6)
    u = lambda kk, shape: jax.random.uniform(kk, shape, jnp.float32, -k, k)
    return {
        "w_ih": u(keys[0], (H, INPUT)),     # nn.RNN weight_ih_l0
        "w_hh": u(keys[1], (H, H)),         # nn.RNN weight_hh_l0
        "b_ih": u(keys[2], (H,)),
        "b_hh": u(keys[3], (H,)),
        "w_out": u(keys[4], (OUTPUT, H)),   # nn.Linear(32, 1).weight
        "b_out": u(keys[5], (OUTPUT,)),
    }


def _reference(x, h_state, params):
    """Pure-JAX reference for sanity checking."""
    def step(h, x_t):
        pre = (x_t @ params["w_ih"].T + params["b_ih"]
               + h @ params["w_hh"].T + params["b_hh"])
        h_new = jnp.tanh(pre)
        y_t = h_new @ params["w_out"].T + params["b_out"]
        return h_new, y_t
    h0 = h_state[0]
    h_final, ys = lax.scan(step, h0, jnp.swapaxes(x, 0, 1))  # scan over time
    return jnp.swapaxes(ys, 0, 1), h_final[None]


if __name__ == "__main__":
    key = jax.random.PRNGKey(0)
    kp, kx = jax.random.split(key, 2)

    B, T = 2, 8
    params = init_params(kp)
    x = jax.random.normal(kx, (B, T, INPUT), jnp.float32)
    # h_state = None in the original script's first call -> zeros init.
    h_state = jnp.zeros((1, B, HIDDEN), jnp.float32)

    y, h_out = rnn_forward(x, h_state, params)
    jax.block_until_ready((y, h_out))

    # Pin the reference's matmul precision too, so both sides use full f32.
    with jax.default_matmul_precision("highest"):
        y_ref, h_ref = _reference(x, h_state, params)
    assert y.shape == (B, T, 1) and h_out.shape == (1, B, HIDDEN)
    assert jnp.allclose(y, y_ref, atol=1e-5), "output mismatch"
    assert jnp.allclose(h_out, h_ref, atol=1e-5), "hidden state mismatch"

    print("KERNEL_OK")
</pallas_src>

<mosaic_0001>
module attributes {stable_mosaic.version = 11 : i64} {
  func.func @_rnn_kernel(%arg0: memref<8x8x1xf32, #tpu.memory_space<vmem>>, %arg1: memref<8x32xf32, #tpu.memory_space<vmem>>, %arg2: memref<1x32xf32, #tpu.memory_space<vmem>>, %arg3: memref<32x32xf32, #tpu.memory_space<vmem>>, %arg4: memref<1x32xf32, #tpu.memory_space<vmem>>, %arg5: memref<1x32xf32, #tpu.memory_space<vmem>>, %arg6: memref<1x1xf32, #tpu.memory_space<vmem>>, %arg7: memref<8x8xf32, #tpu.memory_space<vmem>>, %arg8: memref<8x32xf32, #tpu.memory_space<vmem>>, %arg9: memref<8x8x32xf32, #tpu.memory_space<vmem>>) attributes {dimension_semantics = [], scalar_prefetch = 0 : i64, scratch_operands = 1 : i64, tpu.core_type = #tpu.core_type<tc>} {
    %c0 = arith.constant 0 : index
    %c0_0 = arith.constant 0 : index
    %0 = vector.load %arg3[%c0, %c0_0] : memref<32x32xf32, #tpu.memory_space<vmem>>, vector<32x32xf32>
    %c0_1 = arith.constant 0 : index
    %c0_2 = arith.constant 0 : index
    %c0_3 = arith.constant 0 : index
    %1 = vector.load %arg0[%c0_1, %c0_2, %c0_3] : memref<8x8x1xf32, #tpu.memory_space<vmem>>, vector<8x8x1xf32>
    %c0_4 = arith.constant 0 : index
    %c0_5 = arith.constant 0 : index
    %2 = vector.load %arg2[%c0_4, %c0_5] : memref<1x32xf32, #tpu.memory_space<vmem>>, vector<1x32xf32>
    %3 = vector.shape_cast %2 : vector<1x32xf32> to vector<1x1x32xf32>
    %4 = vector.broadcast %1 : vector<8x8x1xf32> to vector<8x8x32xf32>
    %5 = vector.broadcast %3 : vector<1x1x32xf32> to vector<8x8x32xf32>
    %6 = arith.mulf %4, %5 : vector<8x8x32xf32>
    %c0_6 = arith.constant 0 : index
    %c0_7 = arith.constant 0 : index
    %7 = vector.load %arg4[%c0_6, %c0_7] : memref<1x32xf32, #tpu.memory_space<vmem>>, vector<1x32xf32>
    %8 = vector.shape_cast %7 : vector<1x32xf32> to vector<1x1x32xf32>
    %9 = vector.broadcast %8 : vector<1x1x32xf32> to vector<8x8x32xf32>
    %10 = arith.addf %6, %9 : vector<8x8x32xf32>
    %c0_8 = arith.constant 0 : index
    %c0_9 = arith.constant 0 : index
    %c0_10 = arith.constant 0 : index
    %11 = vector.load %arg9[%c0_8, %c0_9, %c0_10] : memref<8x8x32xf32, #tpu.memory_space<vmem>>, vector<8x8x32xf32>
    tpu.vector_store %arg9[%c0_8, %c0_9, %c0_10], %10 {strides = array<i32>} : memref<8x8x32xf32, #tpu.memory_space<vmem>>, vector<8x8x32xf32>,
    %c0_11 = arith.constant 0 : index
    %c0_12 = arith.constant 0 : index
    %12 = vector.load %arg1[%c0_11, %c0_12] : memref<8x32xf32, #tpu.memory_space<vmem>>, vector<8x32xf32>
    %c0_i32 = arith.constant 0 : i32
    %13 = arith.index_cast %c0_i32 : i32 to index
    %c0_13 = arith.constant 0 : index
    %c0_14 = arith.constant 0 : index
    %14 = vector.load %arg9[%13, %c0_13, %c0_14] : memref<8x8x32xf32, #tpu.memory_space<vmem>>, vector<1x8x32xf32>
    %15 = vector.shape_cast %14 : vector<1x8x32xf32> to vector<8x32xf32>
    %cst = arith.constant dense<0.000000e+00> : vector<8x32xf32>
    %16 = tpu.matmul %12, %0, %cst {dimension_numbers = #tpu.dot_dimension_numbers<[1], [0], [0], [1], [0, 0, 1, 1], [], []>, precision = #tpu.contract_precision<fp32>} : vector<8x32xf32>, vector<32x32xf32>, vector<8x32xf32> -> vector<8x32xf32>
    %17 = arith.addf %15, %16 : vector<8x32xf32>
    %18 = math.tanh %17 : vector<8x32xf32>
    %19 = arith.index_cast %c0_i32 : i32 to index
    %c0_15 = arith.constant 0 : index
    %c0_16 = arith.constant 0 : index
    %20 = vector.load %arg9[%19, %c0_15, %c0_16] : memref<8x8x32xf32, #tpu.memory_space<vmem>>, vector<1x8x32xf32>
    %21 = vector.shape_cast %20 : vector<1x8x32xf32> to vector<8x32xf32>
    %22 = vector.shape_cast %18 : vector<8x32xf32> to vector<1x8x32xf32>
    tpu.vector_store %arg9[%19, %c0_15, %c0_16], %22 {strides = array<i32>} : memref<8x8x32xf32, #tpu.memory_space<vmem>>, vector<1x8x32xf32>,
    %c1_i32 = arith.constant 1 : i32
    %23 = arith.index_cast %c1_i32 : i32 to index
    %c0_17 = arith.constant 0 : index
    %c0_18 = arith.constant 0 : index
    %24 = vector.load %arg9[%23, %c0_17, %c0_18] : memref<8x8x32xf32, #tpu.memory_space<vmem>>, vector<1x8x32xf32>
    %25 = vector.shape_cast %24 : vector<1x8x32xf32> to vector<8x32xf32>
    %cst_19 = arith.constant dense<0.000000e+00> : vector<8x32xf32>
    %26 = tpu.matmul %18, %0, %cst_19 {dimension_numbers = #tpu.dot_dimension_numbers<[1], [0], [0], [1], [0, 0, 1, 1], [], []>, precision = #tpu.contract_precision<fp32>} : vector<8x32xf32>, vector<32x32xf32>, vector<8x32xf32> -> vector<8x32xf32>
    %27 = arith.addf %25, %26 : vector<8x32xf32>
    %28 = math.tanh %27 : vector<8x32xf32>
    %29 = arith.index_cast %c1_i32 : i32 to index
    %c0_20 = arith.constant 0 : index
    %c0_21 = arith.constant 0 : index
    %30 = vector.load %arg9[%29, %c0_20, %c0_21] : memref<8x8x32xf32, #tpu.memory_space<vmem>>, vector<1x8x32xf32>
    %31 = vector.shape_cast %30 : vector<1x8x32xf32> to vector<8x32xf32>
    %32 = vector.shape_cast %28 : vector<8x32xf32> to vector<1x8x32xf32>
    tpu.vector_store %arg9[%29, %c0_20, %c0_21], %32 {strides = array<i32>} : memref<8x8x32xf32, #tpu.memory_space<vmem>>, vector<1x8x32xf32>,
    %c2_i32 = arith.constant 2 : i32
    %33 = arith.index_cast %c2_i32 : i32 to index
    %c0_22 = arith.constant 0 : index
    %c0_23 = arith.constant 0 : index
    %34 = vector.load %arg9[%33, %c0_22, %c0_23] : memref<8x8x32xf32, #tpu.memory_space<vmem>>, vector<1x8x32xf32>
    %35 = vector.shape_cast %34 : vector<1x8x32xf32> to vector<8x32xf32>
    %cst_24 = arith.constant dense<0.000000e+00> : vector<8x32xf32>
    %36 = tpu.matmul %28, %0, %cst_24 {dimension_numbers = #tpu.dot_dimension_numbers<[1], [0], [0], [1], [0, 0, 1, 1], [], []>, precision = #tpu.contract_precision<fp32>} : vector<8x32xf32>, vector<32x32xf32>, vector<8x32xf32> -> vector<8x32xf32>
    %37 = arith.addf %35, %36 : vector<8x32xf32>
    %38 = math.tanh %37 : vector<8x32xf32>
    %39 = arith.index_cast %c2_i32 : i32 to index
    %c0_25 = arith.constant 0 : index
    %c0_26 = arith.constant 0 : index
    %40 = vector.load %arg9[%39, %c0_25, %c0_26] : memref<8x8x32xf32, #tpu.memory_space<vmem>>, vector<1x8x32xf32>
    %41 = vector.shape_cast %40 : vector<1x8x32xf32> to vector<8x32xf32>
    %42 = vector.shape_cast %38 : vector<8x32xf32> to vector<1x8x32xf32>
    tpu.vector_store %arg9[%39, %c0_25, %c0_26], %42 {strides = array<i32>} : memref<8x8x32xf32, #tpu.memory_space<vmem>>, vector<1x8x32xf32>,
    %c3_i32 = arith.constant 3 : i32
    %43 = arith.index_cast %c3_i32 : i32 to index
    %c0_27 = arith.constant 0 : index
    %c0_28 = arith.constant 0 : index
    %44 = vector.load %arg9[%43, %c0_27, %c0_28] : memref<8x8x32xf32, #tpu.memory_space<vmem>>, vector<1x8x32xf32>
    %45 = vector.shape_cast %44 : vector<1x8x32xf32> to vector<8x32xf32>
    %cst_29 = arith.constant dense<0.000000e+00> : vector<8x32xf32>
    %46 = tpu.matmul %38, %0, %cst_29 {dimension_numbers = #tpu.dot_dimension_numbers<[1], [0], [0], [1], [0, 0, 1, 1], [], []>, precision = #tpu.contract_precision<fp32>} : vector<8x32xf32>, vector<32x32xf32>, vector<8x32xf32> -> vector<8x32xf32>
    %47 = arith.addf %45, %46 : vector<8x32xf32>
    %48 = math.tanh %47 : vector<8x32xf32>
    %49 = arith.index_cast %c3_i32 : i32 to index
    %c0_30 = arith.constant 0 : index
    %c0_31 = arith.constant 0 : index
    %50 = vector.load %arg9[%49, %c0_30, %c0_31] : memref<8x8x32xf32, #tpu.memory_space<vmem>>, vector<1x8x32xf32>
    %51 = vector.shape_cast %50 : vector<1x8x32xf32> to vector<8x32xf32>
    %52 = vector.shape_cast %48 : vector<8x32xf32> to vector<1x8x32xf32>
    tpu.vector_store %arg9[%49, %c0_30, %c0_31], %52 {strides = array<i32>} : memref<8x8x32xf32, #tpu.memory_space<vmem>>, vector<1x8x32xf32>,
    %c4_i32 = arith.constant 4 : i32
    %53 = arith.index_cast %c4_i32 : i32 to index
    %c0_32 = arith.constant 0 : index
    %c0_33 = arith.constant 0 : index
    %54 = vector.load %arg9[%53, %c0_32, %c0_33] : memref<8x8x32xf32, #tpu.memory_space<vmem>>, vector<1x8x32xf32>
    %55 = vector.shape_cast %54 : vector<1x8x32xf32> to vector<8x32xf32>
    %cst_34 = arith.constant dense<0.000000e+00> : vector<8x32xf32>
    %56 = tpu.matmul %48, %0, %cst_34 {dimension_numbers = #tpu.dot_dimension_numbers<[1], [0], [0], [1], [0, 0, 1, 1], [], []>, precision = #tpu.contract_precision<fp32>} : vector<8x32xf32>, vector<32x32xf32>, vector<8x32xf32> -> vector<8x32xf32>
    %57 = arith.addf %55, %56 : vector<8x32xf32>
    %58 = math.tanh %57 : vector<8x32xf32>
    %59 = arith.index_cast %c4_i32 : i32 to index
    %c0_35 = arith.constant 0 : index
    %c0_36 = arith.constant 0 : index
    %60 = vector.load %arg9[%59, %c0_35, %c0_36] : memref<8x8x32xf32, #tpu.memory_space<vmem>>, vector<1x8x32xf32>
    %61 = vector.shape_cast %60 : vector<1x8x32xf32> to vector<8x32xf32>
    %62 = vector.shape_cast %58 : vector<8x32xf32> to vector<1x8x32xf32>
    tpu.vector_store %arg9[%59, %c0_35, %c0_36], %62 {strides = array<i32>} : memref<8x8x32xf32, #tpu.memory_space<vmem>>, vector<1x8x32xf32>,
    %c5_i32 = arith.constant 5 : i32
    %63 = arith.index_cast %c5_i32 : i32 to index
    %c0_37 = arith.constant 0 : index
    %c0_38 = arith.constant 0 : index
    %64 = vector.load %arg9[%63, %c0_37, %c0_38] : memref<8x8x32xf32, #tpu.memory_space<vmem>>, vector<1x8x32xf32>
    %65 = vector.shape_cast %64 : vector<1x8x32xf32> to vector<8x32xf32>
    %cst_39 = arith.constant dense<0.000000e+00> : vector<8x32xf32>
    %66 = tpu.matmul %58, %0, %cst_39 {dimension_numbers = #tpu.dot_dimension_numbers<[1], [0], [0], [1], [0, 0, 1, 1], [], []>, precision = #tpu.contract_precision<fp32>} : vector<8x32xf32>, vector<32x32xf32>, vector<8x32xf32> -> vector<8x32xf32>
    %67 = arith.addf %65, %66 : vector<8x32xf32>
    %68 = math.tanh %67 : vector<8x32xf32>
    %69 = arith.index_cast %c5_i32 : i32 to index
    %c0_40 = arith.constant 0 : index
    %c0_41 = arith.constant 0 : index
    %70 = vector.load %arg9[%69, %c0_40, %c0_41] : memref<8x8x32xf32, #tpu.memory_space<vmem>>, vector<1x8x32xf32>
    %71 = vector.shape_cast %70 : vector<1x8x32xf32> to vector<8x32xf32>
    %72 = vector.shape_cast %68 : vector<8x32xf32> to vector<1x8x32xf32>
    tpu.vector_store %arg9[%69, %c0_40, %c0_41], %72 {strides = array<i32>} : memref<8x8x32xf32, #tpu.memory_space<vmem>>, vector<1x8x32xf32>,
    %c6_i32 = arith.constant 6 : i32
    %73 = arith.index_cast %c6_i32 : i32 to index
    %c0_42 = arith.constant 0 : index
    %c0_43 = arith.constant 0 : index
    %74 = vector.load %arg9[%73, %c0_42, %c0_43] : memref<8x8x32xf32, #tpu.memory_space<vmem>>, vector<1x8x32xf32>
    %75 = vector.shape_cast %74 : vector<1x8x32xf32> to vector<8x32xf32>
    %cst_44 = arith.constant dense<0.000000e+00> : vector<8x32xf32>
    %76 = tpu.matmul %68, %0, %cst_44 {dimension_numbers = #tpu.dot_dimension_numbers<[1], [0], [0], [1], [0, 0, 1, 1], [], []>, precision = #tpu.contract_precision<fp32>} : vector<8x32xf32>, vector<32x32xf32>, vector<8x32xf32> -> vector<8x32xf32>
    %77 = arith.addf %75, %76 : vector<8x32xf32>
    %78 = math.tanh %77 : vector<8x32xf32>
    %79 = arith.index_cast %c6_i32 : i32 to index
    %c0_45 = arith.constant 0 : index
    %c0_46 = arith.constant 0 : index
    %80 = vector.load %arg9[%79, %c0_45, %c0_46] : memref<8x8x32xf32, #tpu.memory_space<vmem>>, vector<1x8x32xf32>
    %81 = vector.shape_cast %80 : vector<1x8x32xf32> to vector<8x32xf32>
    %82 = vector.shape_cast %78 : vector<8x32xf32> to vector<1x8x32xf32>
    tpu.vector_store %arg9[%79, %c0_45, %c0_46], %82 {strides = array<i32>} : memref<8x8x32xf32, #tpu.memory_space<vmem>>, vector<1x8x32xf32>,
    %c7_i32 = arith.constant 7 : i32
    %83 = arith.index_cast %c7_i32 : i32 to index
    %c0_47 = arith.constant 0 : index
    %c0_48 = arith.constant 0 : index
    %84 = vector.load %arg9[%83, %c0_47, %c0_48] : memref<8x8x32xf32, #tpu.memory_space<vmem>>, vector<1x8x32xf32>
    %85 = vector.shape_cast %84 : vector<1x8x32xf32> to vector<8x32xf32>
    %cst_49 = arith.constant dense<0.000000e+00> : vector<8x32xf32>
    %86 = tpu.matmul %78, %0, %cst_49 {dimension_numbers = #tpu.dot_dimension_numbers<[1], [0], [0], [1], [0, 0, 1, 1], [], []>, precision = #tpu.contract_precision<fp32>} : vector<8x32xf32>, vector<32x32xf32>, vector<8x32xf32> -> vector<8x32xf32>
    %87 = arith.addf %85, %86 : vector<8x32xf32>
    %88 = math.tanh %87 : vector<8x32xf32>
    %89 = arith.index_cast %c7_i32 : i32 to index
    %c0_50 = arith.constant 0 : index
    %c0_51 = arith.constant 0 : index
    %90 = vector.load %arg9[%89, %c0_50, %c0_51] : memref<8x8x32xf32, #tpu.memory_space<vmem>>, vector<1x8x32xf32>
    %91 = vector.shape_cast %90 : vector<1x8x32xf32> to vector<8x32xf32>
    %92 = vector.shape_cast %88 : vector<8x32xf32> to vector<1x8x32xf32>
    tpu.vector_store %arg9[%89, %c0_50, %c0_51], %92 {strides = array<i32>} : memref<8x8x32xf32, #tpu.memory_space<vmem>>, vector<1x8x32xf32>,
    %c8_i32 = arith.constant 8 : i32
    %c0_52 = arith.constant 0 : index
    %c0_53 = arith.constant 0 : index
    %93 = vector.load %arg8[%c0_52, %c0_53] : memref<8x32xf32, #tpu.memory_space<vmem>>, vector<8x32xf32>
    tpu.vector_store %arg8[%c0_52, %c0_53], %88 {strides = array<i32>} : memref<8x32xf32, #tpu.memory_space<vmem>>, vector<8x32xf32>,
    %c0_54 = arith.constant 0 : index
    %c0_55 = arith.constant 0 : index
    %c0_56 = arith.constant 0 : index
    %94 = vector.load %arg9[%c0_54, %c0_55, %c0_56] : memref<8x8x32xf32, #tpu.memory_space<vmem>>, vector<8x8x32xf32>
    %c0_57 = arith.constant 0 : index
    %c0_58 = arith.constant 0 : index
    %95 = vector.load %arg5[%c0_57, %c0_58] : memref<1x32xf32, #tpu.memory_space<vmem>>, vector<1x32xf32>
    %96 = vector.shape_cast %95 : vector<1x32xf32> to vector<1x1x32xf32>
    %97 = vector.broadcast %96 : vector<1x1x32xf32> to vector<8x8x32xf32>
    %98 = arith.mulf %94, %97 : vector<8x8x32xf32>
    %cst_59 = arith.constant dense<0.000000e+00> : vector<8x8xf32>
    %99 = vector.multi_reduction <add>, %98, %cst_59 [2] : vector<8x8x32xf32> to vector<8x8xf32>
    %c0_60 = arith.constant 0 : index
    %c0_61 = arith.constant 0 : index
    %100 = vector.load %arg6[%c0_60, %c0_61] : memref<1x1xf32, #tpu.memory_space<vmem>>, vector<1x1xf32>
    %101 = vector.broadcast %100 : vector<1x1xf32> to vector<8x8xf32>
    %102 = arith.addf %99, %101 : vector<8x8xf32>
    %c0_62 = arith.constant 0 : index
    %c0_63 = arith.constant 0 : index
    %103 = vector.load %arg7[%c0_62, %c0_63] : memref<8x8xf32, #tpu.memory_space<vmem>>, vector<8x8xf32>
    tpu.vector_store %arg7[%c0_62, %c0_63], %102 {strides = array<i32>} : memref<8x8xf32, #tpu.memory_space<vmem>>, vector<8x8xf32>,
    return
  }
}

</mosaic_0001>

<bundles_post_ra>
// kernel: rnn_forward.1
= control target key start
LH: loop header
LB: loop body
LE: loop exit
PB: predicated region body
PF: predicated region fallthrough
CT: control target
= control target key end

     0   :  { %vm112_vm0 = vcmask 261120   ;;  %v4992_v0 = vmov 0.0   ;;  %vm4993_vm1 = vmmov 0   ;;  %v4994_v12 = vmov 0   ;;  %s5699_s3 = inlined_call_operand.vmem [shape: f32[32,32], index: 3, kind: input, shape index: {}]   ;;  %s5700_s1 = inlined_call_operand.vmem [shape: f32[8,32], index: 1, kind: input, shape index: {}]   ;;  %s5701_s0 = inlined_call_operand.vmem [shape: f32[8,8,1], index: 0, kind: input, shape index: {}]   ;;  %s5702_s2 = inlined_call_operand.vmem [shape: f32[1,32], index: 2, kind: input, shape index: {}]   ;;  %s5703_s4 = inlined_call_operand.vmem [shape: f32[1,32], index: 4, kind: input, shape index: {}]   ;;  %s5704_s5 = inlined_call_operand.vmem [shape: f32[1,32], index: 5, kind: input, shape index: {}]   ;;  %s5705_s6 = inlined_call_operand.<no memory space> [shape: f32[1,1], index: 6, kind: input, shape index: {}]   ;;  %s5706_s8 = inlined_call_operand.vmem [shape: f32[8,32], index: 8, kind: output, shape index: {1}]   ;;  %s5707_s7 = inlined_call_operand.vmem [shape: f32[8,8], index: 7, kind: output, shape index: {0}]  }
   0x1   :  { %4442 = vmatprep.subr.mxu0 %v4992_v0  ;;  %v33_v1 = vld [vmem:[%s5699_s3 + $0x18] sm:$0xff]  ;;  %v32_v2 = vld [vmem:[%s5699_s3 + $0x10] sm:$0xff]  ;;  %v31_v3 = vld [vmem:[%s5699_s3 + $0x8] sm:$0xff]  ;;  %4453 = vmatprep.subr.mxu1 %v4992_v0  ;;  %vm4173_vm2 = vcmask 1041409   ;;  %vm4175_vm3 = vcmask 1042434   ;;  %vm4177_vm4 = vcmask 1043459  }
   0x2   :  { %v5051_v4 = vand.u32 4294901760, %v33_v1  ;;  %v5053_v5 = vand.u32 4294901760, %v32_v2  ;;  %v5055_v6 = vand.u32 4294901760, %v31_v3  ;;  %v30_v7 = vld [vmem:[%s5699_s3] sm:$0xff]  ;;  %4450 = vmatprep.mubr.msk.f32.mxu0 %vm4993_vm1, %v4992_v0  ;;  %4461 = vmatprep.mubr.msk.f32.mxu1 %vm4993_vm1, %v4992_v0  ;;  %v35_v18 = vld [vmem:[%s5701_s0 + $0x8] sm:$0xff]  ;;  %v40_v36 = vld [vmem:[%s5701_s0 + $0x30] sm:$0xff] }
   0x3   :  { %v121_v8 = vld [vmem:[%s5700_s1] sm:$0xff]  ;;  %v5070_v10 = vand.u32 4294901760, %v30_v7  ;;  %4973 = vset.pattern.permute.xlu0 %v4994_v12  ;;  %4974 = vset.pattern.permute.xlu1 %v4994_v12  ;;  %vm4179_vm5 = vcmask 1044484   ;;  %vm4181_vm6 = vcmask 1045509   ;;  %vm4183_vm7 = vcmask 1046534  }
   0x4   :  { %v34_v9 = vld [vmem:[%s5701_s0] sm:$0xff]  ;;  %v124_v11 = vsel %vm112_vm0, %v121_v8, 0  ;;  %4443 = vmatpush3.msra.mxu0 %v5051_v4  ;;  %v5075_v13 = vsub.f32 %v33_v1, %v5051_v4  ;;  %v5080_v15 = vsub.f32 %v32_v2, %v5053_v5  ;;  %v5083_v16 = vsub.f32 %v31_v3, %v5055_v6 }
   0x5   :  { %v5077_v14 = vand.u32 4294901760, %v124_v11  ;;  %45 = vperm.xlu0 %4973, %v34_v9   ;;  %4444 = vmatprep.subr.mxu0 %v4992_v0  ;;  %v5087_v17 = vsub.f32 %v30_v7, %v5070_v10  ;;  %v38_v28 = vld [vmem:[%s5701_s0 + $0x20] sm:$0xff]  ;;  %vm4185_vm8 = vcmask 1047559   ;;  %vm4188_vm9 = vcmask 64512  }
   0x6   :  { %4445 = vmatpush3.msra.mxu0 %v5053_v5  ;;  %v5094_v19 = vand.u32 4294901760, %v5075_v13  ;;  %v5098_v21 = vand.u32 4294901760, %v5080_v15  ;;  %v5101_v22 = vand.u32 4294901760, %v5083_v16  ;;  %v5207_v37 = vld [vmem:[%s5702_s2] ss:$0 sm:$0xff] }
   0x7   :  { %v196_v20 = vsub.f32 %v124_v11, %v5077_v14  ;;  %4446 = vmatprep.subr.mxu0 %v4992_v0  ;;  %v5105_v23 = vand.u32 4294901760, %v5087_v17  ;;  %v5212_v38 = vld [vmem:[%s5703_s4] ss:$0 sm:$0xff] }
   0x8   :  { %4447 = vmatpush3.msra.mxu0 %v5055_v6  ;;  %v233_v24 = vsub.f32 %v5075_v13, %v5094_v19  ;;  %v240_v26 = vsub.f32 %v5080_v15, %v5098_v21  ;;  %v247_v27 = vsub.f32 %v5083_v16, %v5101_v22 }
   0x9   :  { %v197_v25 = vand.u32 4294901760, %v196_v20  ;;  %50 = vperm.xlu0 %4973, %v35_v18   ;;  %4448 = vmatprep.subr.mxu0 %v4992_v0  ;;  %v254_v32 = vsub.f32 %v5087_v17, %v5105_v23 }
   0xa   :  { %4449 = vmatpush3.msra.mxu0 %v5070_v10  ;;  %v5119_v29 = vand.u32 4294901760, %v233_v24  ;;  %v5121_v31 = vand.u32 4294901760, %v240_v26  ;;  %v5127_v34 = vand.u32 4294901760, %v247_v27  ;;  %v5235_v24 = vld [vmem:[%s5704_s5] ss:$0 sm:$0xff] }
   0xb   :  { %v198_v30 = vsub.f32 %v196_v20, %v197_v25  ;;  %4464 = vmatprep.subr.mxu0 %v4992_v0  ;;  %v5131_v35 = vand.u32 4294901760, %v254_v32  ;;  %v36_v32 = vld [vmem:[%s5701_s0 + $0x10] sm:$0xff] }
   0xc   :  { %4454 = vmatpush3.msra.mxu1 %v5119_v29  ;;  %55 = vperm.xlu1 %4974, %v36_v32  }
   0xd   :  { %v199_v33 = vand.u32 4294901760, %v198_v30  ;;  %65 = vperm.xlu0 %4973, %v38_v28   ;;  %4455 = vmatprep.subr.mxu1 %v4992_v0 }
   0xe   :  { %4456 = vmatpush3.msra.mxu1 %v5121_v31 }
   0xf   :  { %4451 = vmatmul.mubr.f32.vlgmr.msra.gmra.mxu0 %v199_v33  ;;  %4457 = vmatprep.subr.mxu1 %v4992_v0  ;;  %v37_v33 = vld [vmem:[%s5701_s0 + $0x18] sm:$0xff] }
  0x10   :  { %4465 = vmatpush3.msra.mxu0 %v5075_v13  ;;  %4458 = vmatpush3.msra.mxu1 %v5127_v34 }
  0x11   :  { %4466 = vmatprep.subr.mxu0 %v4992_v0  ;;  %4459 = vmatprep.subr.mxu1 %v4992_v0 }
  0x12   :  { %4467 = vmatpush3.msra.mxu0 %v5080_v15  ;;  %4460 = vmatpush3.msra.mxu1 %v5131_v35 }
  0x13   :  { %4468 = vmatprep.subr.mxu0 %v4992_v0  ;;  %4462 = vmatmul.mubr.f32.vlgmr.msra.gmra.mxu1 %v5077_v14 }
  0x14   :  { %4469 = vmatpush3.msra.mxu0 %v5083_v16  ;;  %4475 = vmatprep.subr.mxu1 %v4992_v0 }
  0x15   :  { %4470 = vmatprep.subr.mxu0 %v4992_v0  ;;  %4472 = vmatprep.mubr.msk.f32.mxu0 %vm4993_vm1, %v4992_v0 }
  0x16   :  { %4471 = vmatpush3.msra.mxu0 %v5087_v17  ;;  %4476 = vmatpush3.msra.mxu1 %v5051_v4 }
  0x17   :  { %4473 = vmatmul.mubr.f32.vlgmr.msra.gmra.mxu0 %v196_v20  ;;  %4477 = vmatprep.subr.mxu1 %v4992_v0 }
  0x18   :  { %4486 = vmatprep.subr.mxu0 %v4992_v0  ;;  %4478 = vmatpush3.msra.mxu1 %v5053_v5 }
  0x19   :  { %4487 = vmatpush3.msra.mxu0 %v5094_v19  ;;  %4479 = vmatprep.subr.mxu1 %v4992_v0 }
  0x1a   :  { %4488 = vmatprep.subr.mxu0 %v4992_v0  ;;  %4480 = vmatpush3.msra.mxu1 %v5055_v6 }
  0x1b   :  { %4489 = vmatpush3.msra.mxu0 %v5098_v21  ;;  %4481 = vmatprep.subr.mxu1 %v4992_v0 }
  0x1c   :  { %4490 = vmatprep.subr.mxu0 %v4992_v0  ;;  %4482 = vmatpush3.msra.mxu1 %v5070_v10 }
  0x1d   :  { %4483 = vmatprep.mubr.msk.f32.mxu1 %vm4993_vm1, %v4992_v0  ;;  %4491 = vmatpush3.msra.mxu0 %v5101_v22 }
  0x1e   :  { %4484 = vmatmul.mubr.f32.vlgmr.msra.gmra.mxu1 %v197_v25  ;;  %4492 = vmatprep.subr.mxu0 %v4992_v0 }
  0x1f   :  { %4497 = vmatprep.subr.mxu1 %v4992_v0  ;;  %4493 = vmatpush3.msra.mxu0 %v5105_v23 }
  0x20   :  { %4494 = vmatprep.mubr.msk.f32.mxu0 %vm4993_vm1, %v4992_v0  ;;  %4498 = vmatpush3.msra.mxu1 %v5051_v4 }
  0x21   :  { %4495 = vmatmul.mubr.f32.vlgmr.msra.gmra.mxu0 %v5077_v14  ;;  %4499 = vmatprep.subr.mxu1 %v4992_v0 }
  0x22   :  { %4505 = vmatprep.mubr.msk.f32.mxu1 %vm4993_vm1, %v4992_v0  ;;  %4500 = vmatpush3.msra.mxu1 %v5053_v5 }
  0x23   :  { %75 = vperm.xlu0 %4973, %v40_v36   ;;  %4501 = vmatprep.subr.mxu1 %v4992_v0  ;;  %v39_v36 = vld [vmem:[%s5701_s0 + $0x28] sm:$0xff] }
  0x24   :  { %4508 = vmatprep.subr.mxu0 %v4992_v0  ;;  %4502 = vmatpush3.msra.mxu1 %v5055_v6 }
  0x25   :  { %4509 = vmatpush3.msra.mxu0 %v5051_v4  ;;  %4503 = vmatprep.subr.mxu1 %v4992_v0 }
  0x26   :  { %4510 = vmatprep.subr.mxu0 %v4992_v0  ;;  %4504 = vmatpush3.msra.mxu1 %v5070_v10 }
  0x27   :  { %4511 = vmatpush3.msra.mxu0 %v5053_v5  ;;  %4506 = vmatmul.mubr.f32.vlgmr.msra.gmra.mxu1 %v5077_v14 }
  0x28   :  { %4519 = vmatprep.subr.mxu1 %v4992_v0  ;;  %4527 = vmatprep.mubr.msk.f32.mxu1 %vm4993_vm1, %v4992_v0 }
  0x29   :  { %4520 = vmatpush3.msra.mxu1 %v5119_v29  ;;  %4512 = vmatprep.subr.mxu0 %v4992_v0 }
  0x2a   :  { %4521 = vmatprep.subr.mxu1 %v4992_v0  ;;  %4513 = vmatpush3.msra.mxu0 %v5055_v6 }
  0x2b   :  { %4522 = vmatpush3.msra.mxu1 %v5121_v31  ;;  %4514 = vmatprep.subr.mxu0 %v4992_v0 }
  0x2c   :  { %4523 = vmatprep.subr.mxu1 %v4992_v0  ;;  %4515 = vmatpush3.msra.mxu0 %v5070_v10 }
  0x2d   :  { %4524 = vmatpush3.msra.mxu1 %v5127_v34  ;;  %4516 = vmatprep.mubr.msk.f32.mxu0 %vm4993_vm1, %v4992_v0 }
  0x2e   :  { %4525 = vmatprep.subr.mxu1 %v4992_v0  ;;  %4530 = vmatprep.subr.mxu0 %v4992_v0 }
  0x2f   :  { %4526 = vmatpush3.msra.mxu1 %v5131_v35  ;;  %60 = vperm.xlu1 %4974, %v37_v33  }
  0x30   :  { %4541 = vmatprep.subr.mxu1 %v4992_v0 }
  0x33   :  { %70 = vperm.xlu1 %4974, %v39_v36  }
  0x80   :  { %v46_v39 = vpop.permute.xlu0 %45 }
  0x81   :  { %v89_v40 = vmul.f32 %v5207_v37, %v46_v39  ;;  %v41_v39 = vld [vmem:[%s5701_s0 + $0x38] sm:$0xff] }
  0x82   :  { %80 = vperm.xlu1 %4974, %v41_v39  }
  0x83   :  { %v104_v41 = vadd.f32 %v5212_v38, %v89_v40 }
  0x84   :  { %v51_v42 = vpop.permute.xlu0 %50 }
  0x85   :  { %113 = vst.msk [vmem:[#allocation2] sm:$0xff] %vm112_vm0, %v104_v41  ;;  %v90_v43 = vmul.f32 %v5207_v37, %v51_v42 }
  0x87   :  { %v105_v44 = vadd.f32 %v5212_v38, %v90_v43  ;;  %v56_v40 = vpop.permute.xlu1 %55 }
  0x88   :  { %v66_v45 = vpop.permute.xlu0 %65  ;;  %v91_v41 = vmul.f32 %v5207_v37, %v56_v40 }
  0x89   :  { %114 = vst.msk [vmem:[#allocation2 + $0x8] sm:$0xff] %vm112_vm0, %v105_v44  ;;  %v93_v46 = vmul.f32 %v5207_v37, %v66_v45 }
  0x8a   :  { %v106_v43 = vadd.f32 %v5212_v38, %v91_v41 }
  0x8b   :  { %v108_v47 = vadd.f32 %v5212_v38, %v93_v46 }
  0x8c   :  { %v122_v2 = vld [vmem:[#allocation2] sm:$0xff]  ;;  %115 = vst.msk [vmem:[#allocation2 + $0x10] sm:$0xff] %vm112_vm0, %v106_v43 }
  0x8d   :  { %117 = vst.msk [vmem:[#allocation2 + $0x20] sm:$0xff] %vm112_vm0, %v108_v47 }
  0x9e   :  { %v76_v48 = vpop.permute.xlu0 %75 }
  0x9f   :  { %v95_v49 = vmul.f32 %v5207_v37, %v76_v48 }
  0xa1   :  { %v110_v50 = vadd.f32 %v5212_v38, %v95_v49 }
  0xa3   :  { %119 = vst.msk [vmem:[#allocation2 + $0x30] sm:$0xff] %vm112_vm0, %v110_v50 }
  0xaa   :  { %v61_v45 = vpop.permute.xlu1 %60 }
  0xab   :  { %v92_v47 = vmul.f32 %v5207_v37, %v61_v45 }
  0xad   :  { %v107_v50 = vadd.f32 %v5212_v38, %v92_v47 }
  0xaf   :  { %116 = vst.msk [vmem:[#allocation2 + $0x18] sm:$0xff] %vm112_vm0, %v107_v50  ;;  %v1108_v50 = vld [vmem:[#allocation2 + $0x10] sm:$0xff] }
  0xcf   :  { %v201_v51 = vpop.f32.mrf.mxu0 }
  0xd1   :  { %v4452_v52 = vpop.f32.mrf.mxu0 }
  0xd2   :  { %v71_v52 = vpop.permute.xlu1 %70 }
  0xd3   :  { %v292_v53 = vpop.f32.mrf.mxu1 }
  0xd4   :  { %v293_v57 = vadd.f32 %v292_v53, %v201_v51  ;;  %v94_v53 = vmul.f32 %v5207_v37, %v71_v52 }
  0xd5   :  { %v4463_v54 = vpop.f32.mrf.mxu1 }
  0xd6   :  { %v109_v54 = vadd.f32 %v5212_v38, %v94_v53 }
  0xd7   :  { %v372_v55 = vpop.f32.mrf.mxu0 }
  0xd8   :  { %v373_v60 = vadd.f32 %v372_v55, %v293_v57  ;;  %118 = vst.msk [vmem:[#allocation2 + $0x28] sm:$0xff] %vm112_vm0, %v109_v54 }
  0xd9   :  { %v4474_v56 = vpop.f32.mrf.mxu0 }
  0xde   :  { %v449_v58 = vpop.f32.mrf.mxu1 }
  0xdf   :  { %v450_v62 = vadd.f32 %v449_v58, %v373_v60 }
  0xe0   :  { %v4485_v59 = vpop.f32.mrf.mxu1 }
  0xe1   :  { %v532_v61 = vpop.f32.mrf.mxu0 }
  0xe2   :  { %v533_v1 = vadd.f32 %v532_v61, %v450_v62 }
  0xe3   :  { %v4496_v63 = vpop.f32.mrf.mxu0 }
  0xe7   :  { %v607_v3 = vpop.f32.mrf.mxu1 }
  0xe8   :  { %v608_v7 = vadd.f32 %v607_v3, %v533_v1 }
  0xe9   :  { %v4507_v8 = vpop.f32.mrf.mxu1 }
  0xea   :  { %v611_v9 = vadd.f32 %v608_v7, %v122_v2 }
  0xec   :  { %4975 = vtanh.f32 %v611_v9  ;;  %v615_v9 = vld [vmem:[#allocation2 + $0x8] sm:$0xff] }
  0xf9   :  { %v4976_v11 = vpop.eup %4975 }
  0xfa   :  { %613 = vst.msk [vmem:[#allocation2] sm:$0xff] %vm112_vm0, %v4976_v11  ;;  %v617_v12 = vsel %vm112_vm0, %v4976_v11, 0 }
  0xfb   :  { %v688_v14 = vand.u32 4294901760, %v617_v12 }
  0xfd   :  { %v689_v18 = vsub.f32 %v617_v12, %v688_v14  ;;  %4528 = vmatmul.mubr.f32.vlgmr.msra.gmra.mxu1 %v688_v14  ;;  %v81_v55 = vpop.permute.xlu1 %80 }
  0xfe   :  { %4542 = vmatpush3.msra.mxu1 %v5051_v4  ;;  %4549 = vmatprep.mubr.msk.f32.mxu1 %vm4993_vm1, %v4992_v0  ;;  %v96_v57 = vmul.f32 %v5207_v37, %v81_v55 }
  0xff   :  { %4543 = vmatprep.subr.mxu1 %v4992_v0  ;;  %v690_v20 = vand.u32 4294901760, %v689_v18 }
 0x100   :  { %4544 = vmatpush3.msra.mxu1 %v5053_v5  ;;  %v111_v61 = vadd.f32 %v5212_v38, %v96_v57 }
 0x101   :  { %4545 = vmatprep.subr.mxu1 %v4992_v0  ;;  %v691_v25 = vsub.f32 %v689_v18, %v690_v20  ;;  %v4066_v26 = vld [vmem:[#allocation2] sm:$0xff] }
 0x102   :  { %4546 = vmatpush3.msra.mxu1 %v5055_v6  ;;  %v4081_v27 = vmul.f32 %v5235_v24, %v4066_v26  ;;  %120 = vst.msk [vmem:[#allocation2 + $0x38] sm:$0xff] %vm112_vm0, %v111_v61 }
 0x103   :  { %4547 = vmatprep.subr.mxu1 %v4992_v0  ;;  %v692_v28 = vand.u32 4294901760, %v691_v25 }
 0x104   :  { %4548 = vmatpush3.msra.mxu1 %v5070_v10  ;;  %v4089_v30 = vsel %vm112_vm0, %v4081_v27, 0.0 }
 0x105   :  { %4550 = vmatmul.mubr.f32.vlgmr.msra.gmra.mxu1 %v690_v20  ;;  %4563 = vmatprep.subr.mxu1 %v4992_v0 }
 0x106   :  { %4517 = vmatmul.mubr.f32.vlgmr.msra.gmra.mxu0 %v692_v28  ;;  %4564 = vmatpush3.msra.mxu1 %v5051_v4 }
 0x107   :  { %4531 = vmatpush3.msra.mxu0 %v5075_v13  ;;  %4090 = vadd.xlane.f32.xlu0 %v4089_v30 }
 0x108   :  { %4532 = vmatprep.subr.mxu0 %v4992_v0  ;;  %4565 = vmatprep.subr.mxu1 %v4992_v0 }
 0x109   :  { %4533 = vmatpush3.msra.mxu0 %v5080_v15  ;;  %4566 = vmatpush3.msra.mxu1 %v5053_v5 }
 0x10a   :  { %4534 = vmatprep.subr.mxu0 %v4992_v0  ;;  %4567 = vmatprep.subr.mxu1 %v4992_v0 }
 0x10b   :  { %4535 = vmatpush3.msra.mxu0 %v5083_v16  ;;  %4568 = vmatpush3.msra.mxu1 %v5055_v6 }
 0x10c   :  { %4536 = vmatprep.subr.mxu0 %v4992_v0  ;;  %4569 = vmatprep.subr.mxu1 %v4992_v0 }
 0x10d   :  { %4537 = vmatpush3.msra.mxu0 %v5087_v17  ;;  %4538 = vmatprep.mubr.msk.f32.mxu0 %vm4993_vm1, %v4992_v0 }
 0x10e   :  { %4570 = vmatpush3.msra.mxu1 %v5070_v10  ;;  %4571 = vmatprep.mubr.msk.f32.mxu1 %vm4993_vm1, %v4992_v0 }
 0x10f   :  { %4539 = vmatmul.mubr.f32.vlgmr.msra.gmra.mxu0 %v689_v18  ;;  %4552 = vmatprep.subr.mxu0 %v4992_v0 }
 0x110   :  { %4572 = vmatmul.mubr.f32.vlgmr.msra.gmra.mxu1 %v688_v14  ;;  %4553 = vmatpush3.msra.mxu0 %v5094_v19 }
 0x111   :  { %4554 = vmatprep.subr.mxu0 %v4992_v0  ;;  %4560 = vmatprep.mubr.msk.f32.mxu0 %vm4993_vm1, %v4992_v0 }
 0x112   :  { %4555 = vmatpush3.msra.mxu0 %v5098_v21  ;;  %4585 = vmatprep.subr.mxu1 %v4992_v0 }
 0x113   :  { %4556 = vmatprep.subr.mxu0 %v4992_v0  ;;  %4586 = vmatpush3.msra.mxu1 %v5119_v29 }
 0x114   :  { %4557 = vmatpush3.msra.mxu0 %v5101_v22  ;;  %4587 = vmatprep.subr.mxu1 %v4992_v0 }
 0x115   :  { %4558 = vmatprep.subr.mxu0 %v4992_v0  ;;  %4588 = vmatpush3.msra.mxu1 %v5121_v31 }
 0x116   :  { %4559 = vmatpush3.msra.mxu0 %v5105_v23  ;;  %4589 = vmatprep.subr.mxu1 %v4992_v0 }
 0x117   :  { %4561 = vmatmul.mubr.f32.vlgmr.msra.gmra.mxu0 %v688_v14  ;;  %4590 = vmatpush3.msra.mxu1 %v5127_v34 }
 0x118   :  { %4591 = vmatprep.subr.mxu1 %v4992_v0  ;;  %4574 = vmatprep.subr.mxu0 %v4992_v0 }
 0x119   :  { %4592 = vmatpush3.msra.mxu1 %v5131_v35  ;;  %4593 = vmatprep.mubr.msk.f32.mxu1 %vm4993_vm1, %v4992_v0 }
 0x11a   :  { %4607 = vmatprep.subr.mxu1 %v4992_v0  ;;  %4575 = vmatpush3.msra.mxu0 %v5051_v4 }
 0x11b   :  { %4576 = vmatprep.subr.mxu0 %v4992_v0  ;;  %4582 = vmatprep.mubr.msk.f32.mxu0 %vm4993_vm1, %v4992_v0 }
 0x11c   :  { %4577 = vmatpush3.msra.mxu0 %v5053_v5 }
 0x11d   :  { %4578 = vmatprep.subr.mxu0 %v4992_v0 }
 0x11e   :  { %4579 = vmatpush3.msra.mxu0 %v5055_v6 }
 0x11f   :  { %4580 = vmatprep.subr.mxu0 %v4992_v0 }
 0x120   :  { %4581 = vmatpush3.msra.mxu0 %v5070_v10 }
 0x121   :  { %4596 = vmatprep.subr.mxu0 %v4992_v0 }
 0x1bd   :  { %v785_v42 = vpop.f32.mrf.mxu1 }
 0x1bf   :  { %v4529_v44 = vpop.f32.mrf.mxu1 }
 0x1c5   :  { %v942_v46 = vpop.f32.mrf.mxu1 }
 0x1c6   :  { %v694_v48 = vpop.f32.mrf.mxu0 }
 0x1c7   :  { %v4551_v49 = vpop.f32.mrf.mxu1  ;;  %v786_v58 = vadd.f32 %v785_v42, %v694_v48 }
 0x1c8   :  { %v4518_v51 = vpop.f32.mrf.mxu0 }
 0x1cf   :  { %v865_v56 = vpop.f32.mrf.mxu0 }
 0x1d0   :  { %v1100_v59 = vpop.f32.mrf.mxu1  ;;  %v866_v62 = vadd.f32 %v865_v56, %v786_v58 }
 0x1d1   :  { %v4540_v60 = vpop.f32.mrf.mxu0 }
 0x1d2   :  { %v4573_v63 = vpop.f32.mrf.mxu1  ;;  %v943_v1 = vadd.f32 %v942_v46, %v866_v62 }
 0x1d7   :  { %v1025_v2 = vpop.f32.mrf.mxu0 }
 0x1d8   :  { %v1026_v3 = vadd.f32 %v1025_v2, %v943_v1 }
 0x1d9   :  { %v4562_v7 = vpop.f32.mrf.mxu0 }
 0x1da   :  { %v1101_v8 = vadd.f32 %v1100_v59, %v1026_v3 }
 0x1dc   :  { %v1104_v11 = vadd.f32 %v1101_v8, %v615_v9 }
 0x1de   :  { %4977 = vtanh.f32 %v1104_v11 }
 0x1eb   :  { %v4978_v12 = vpop.eup %4977 }
 0x1ec   :  { %1106 = vst.msk [vmem:[#allocation2 + $0x8] sm:$0xff] %vm112_vm0, %v4978_v12  ;;  %v1110_v37 = vsel %vm112_vm0, %v4978_v12, 0 }
 0x1ed   :  { %v1181_v14 = vand.u32 4294901760, %v1110_v37 }
 0x1ef   :  { %v1182_v18 = vsub.f32 %v1110_v37, %v1181_v14  ;;  %4594 = vmatmul.mubr.f32.vlgmr.msra.gmra.mxu1 %v1181_v14 }
 0x1f0   :  { %4608 = vmatpush3.msra.mxu1 %v5051_v4  ;;  %4615 = vmatprep.mubr.msk.f32.mxu1 %vm4993_vm1, %v4992_v0 }
 0x1f1   :  { %4609 = vmatprep.subr.mxu1 %v4992_v0  ;;  %v1183_v38 = vand.u32 4294901760, %v1182_v18 }
 0x1f2   :  { %4610 = vmatpush3.msra.mxu1 %v5053_v5 }
 0x1f3   :  { %4611 = vmatprep.subr.mxu1 %v4992_v0  ;;  %v1184_v20 = vsub.f32 %v1182_v18, %v1183_v38  ;;  %v4067_v25 = vld [vmem:[#allocation2 + $0x8] sm:$0xff] }
 0x1f4   :  { %4612 = vmatpush3.msra.mxu1 %v5055_v6  ;;  %v4082_v26 = vmul.f32 %v5235_v24, %v4067_v25 }
 0x1f5   :  { %4613 = vmatprep.subr.mxu1 %v4992_v0  ;;  %v1185_v27 = vand.u32 4294901760, %v1184_v20 }
 0x1f6   :  { %4614 = vmatpush3.msra.mxu1 %v5070_v10  ;;  %v4092_v28 = vsel %vm112_vm0, %v4082_v26, 0.0 }
 0x1f7   :  { %4616 = vmatmul.mubr.f32.vlgmr.msra.gmra.mxu1 %v1183_v38  ;;  %4629 = vmatprep.subr.mxu1 %v4992_v0 }
 0x1f8   :  { %4583 = vmatmul.mubr.f32.vlgmr.msra.gmra.mxu0 %v1185_v27  ;;  %4630 = vmatpush3.msra.mxu1 %v5051_v4 }
 0x1f9   :  { %4597 = vmatpush3.msra.mxu0 %v5075_v13  ;;  %4093 = vadd.xlane.f32.xlu1 %v4092_v28 }
 0x1fa   :  { %4598 = vmatprep.subr.mxu0 %v4992_v0  ;;  %4631 = vmatprep.subr.mxu1 %v4992_v0 }
 0x1fb   :  { %4599 = vmatpush3.msra.mxu0 %v5080_v15  ;;  %4632 = vmatpush3.msra.mxu1 %v5053_v5 }
 0x1fc   :  { %4600 = vmatprep.subr.mxu0 %v4992_v0  ;;  %4633 = vmatprep.subr.mxu1 %v4992_v0 }
 0x1fd   :  { %4601 = vmatpush3.msra.mxu0 %v5083_v16  ;;  %4634 = vmatpush3.msra.mxu1 %v5055_v6 }
 0x1fe   :  { %4602 = vmatprep.subr.mxu0 %v4992_v0  ;;  %4635 = vmatprep.subr.mxu1 %v4992_v0 }
 0x1ff   :  { %4603 = vmatpush3.msra.mxu0 %v5087_v17  ;;  %4604 = vmatprep.mubr.msk.f32.mxu0 %vm4993_vm1, %v4992_v0 }
 0x200   :  { %4636 = vmatpush3.msra.mxu1 %v5070_v10  ;;  %4637 = vmatprep.mubr.msk.f32.mxu1 %vm4993_vm1, %v4992_v0 }
 0x201   :  { %4605 = vmatmul.mubr.f32.vlgmr.msra.gmra.mxu0 %v1182_v18  ;;  %4618 = vmatprep.subr.mxu0 %v4992_v0 }
 0x202   :  { %4638 = vmatmul.mubr.f32.vlgmr.msra.gmra.mxu1 %v1181_v14  ;;  %4619 = vmatpush3.msra.mxu0 %v5094_v19 }
 0x203   :  { %4620 = vmatprep.subr.mxu0 %v4992_v0  ;;  %4626 = vmatprep.mubr.msk.f32.mxu0 %vm4993_vm1, %v4992_v0 }
 0x204   :  { %4621 = vmatpush3.msra.mxu0 %v5098_v21  ;;  %4651 = vmatprep.subr.mxu1 %v4992_v0 }
 0x205   :  { %4622 = vmatprep.subr.mxu0 %v4992_v0  ;;  %4652 = vmatpush3.msra.mxu1 %v5119_v29 }
 0x206   :  { %4623 = vmatpush3.msra.mxu0 %v5101_v22  ;;  %4653 = vmatprep.subr.mxu1 %v4992_v0 }
 0x207   :  { %4624 = vmatprep.subr.mxu0 %v4992_v0  ;;  %4654 = vmatpush3.msra.mxu1 %v5121_v31 }
 0x208   :  { %4625 = vmatpush3.msra.mxu0 %v5105_v23  ;;  %4655 = vmatprep.subr.mxu1 %v4992_v0 }
 0x209   :  { %4627 = vmatmul.mubr.f32.vlgmr.msra.gmra.mxu0 %v1181_v14  ;;  %4656 = vmatpush3.msra.mxu1 %v5127_v34 }
 0x20a   :  { %4657 = vmatprep.subr.mxu1 %v4992_v0  ;;  %4640 = vmatprep.subr.mxu0 %v4992_v0 }
 0x20b   :  { %4658 = vmatpush3.msra.mxu1 %v5131_v35  ;;  %4659 = vmatprep.mubr.msk.f32.mxu1 %vm4993_vm1, %v4992_v0 }
 0x20c   :  { %4673 = vmatprep.subr.mxu1 %v4992_v0  ;;  %4641 = vmatpush3.msra.mxu0 %v5051_v4 }
 0x20d   :  { %4642 = vmatprep.subr.mxu0 %v4992_v0  ;;  %4648 = vmatprep.mubr.msk.f32.mxu0 %vm4993_vm1, %v4992_v0 }
 0x20e   :  { %4643 = vmatpush3.msra.mxu0 %v5053_v5 }
 0x20f   :  { %4644 = vmatprep.subr.mxu0 %v4992_v0 }
 0x210   :  { %4645 = vmatpush3.msra.mxu0 %v5055_v6 }
 0x211   :  { %4646 = vmatprep.subr.mxu0 %v4992_v0 }
 0x212   :  { %4647 = vmatpush3.msra.mxu0 %v5070_v10 }
 0x213   :  { %4662 = vmatprep.subr.mxu0 %v4992_v0 }
 0x2af   :  { %v1278_v30 = vpop.f32.mrf.mxu1 }
 0x2b1   :  { %v4595_v32 = vpop.f32.mrf.mxu1 }
 0x2b7   :  { %v1435_v33 = vpop.f32.mrf.mxu1 }
 0x2b8   :  { %v1187_v36 = vpop.f32.mrf.mxu0 }
 0x2b9   :  { %v4617_v39 = vpop.f32.mrf.mxu1  ;;  %v1279_v42 = vadd.f32 %v1278_v30, %v1187_v36  ;;  %v1601_v30 = vld [vmem:[#allocation2 + $0x18] sm:$0xff] }
 0x2ba   :  { %v4584_v40 = vpop.f32.mrf.mxu0 }
 0x2c1   :  { %v1358_v41 = vpop.f32.mrf.mxu0 }
 0x2c2   :  { %v1593_v43 = vpop.f32.mrf.mxu1  ;;  %v1359_v45 = vadd.f32 %v1358_v41, %v1279_v42 }
 0x2c3   :  { %v4606_v44 = vpop.f32.mrf.mxu0 }
 0x2c4   :  { %v4639_v46 = vpop.f32.mrf.mxu1  ;;  %v1436_v47 = vadd.f32 %v1435_v33, %v1359_v45 }
 0x2c9   :  { %v1518_v48 = vpop.f32.mrf.mxu0 }
 0x2ca   :  { %v1519_v49 = vadd.f32 %v1518_v48, %v1436_v47 }
 0x2cb   :  { %v4628_v51 = vpop.f32.mrf.mxu0 }
 0x2cc   :  { %v1594_v52 = vadd.f32 %v1593_v43, %v1519_v49 }
 0x2ce   :  { %v1597_v53 = vadd.f32 %v1594_v52, %v1108_v50 }
 0x2d0   :  { %4979 = vtanh.f32 %v1597_v53 }
 0x2dd   :  { %v4980_v54 = vpop.eup %4979 }
 0x2de   :  { %1599 = vst.msk [vmem:[#allocation2 + $0x10] sm:$0xff] %vm112_vm0, %v4980_v54  ;;  %v1603_v55 = vsel %vm112_vm0, %v4980_v54, 0 }
 0x2df   :  { %v1674_v56 = vand.u32 4294901760, %v1603_v55 }
 0x2e1   :  { %v1675_v57 = vsub.f32 %v1603_v55, %v1674_v56  ;;  %4660 = vmatmul.mubr.f32.vlgmr.msra.gmra.mxu1 %v1674_v56 }
 0x2e2   :  { %4674 = vmatpush3.msra.mxu1 %v5051_v4  ;;  %4681 = vmatprep.mubr.msk.f32.mxu1 %vm4993_vm1, %v4992_v0 }
 0x2e3   :  { %4675 = vmatprep.subr.mxu1 %v4992_v0  ;;  %v1676_v58 = vand.u32 4294901760, %v1675_v57 }
 0x2e4   :  { %4676 = vmatpush3.msra.mxu1 %v5053_v5 }
 0x2e5   :  { %4677 = vmatprep.subr.mxu1 %v4992_v0  ;;  %v1677_v59 = vsub.f32 %v1675_v57, %v1676_v58  ;;  %v4068_v60 = vld [vmem:[#allocation2 + $0x10] sm:$0xff] }
 0x2e6   :  { %4678 = vmatpush3.msra.mxu1 %v5055_v6  ;;  %v4083_v61 = vmul.f32 %v5235_v24, %v4068_v60 }
 0x2e7   :  { %4679 = vmatprep.subr.mxu1 %v4992_v0  ;;  %v1678_v62 = vand.u32 4294901760, %v1677_v59 }
 0x2e8   :  { %4680 = vmatpush3.msra.mxu1 %v5070_v10  ;;  %v4095_v63 = vsel %vm112_vm0, %v4083_v61, 0.0 }
 0x2e9   :  { %4682 = vmatmul.mubr.f32.vlgmr.msra.gmra.mxu1 %v1676_v58  ;;  %4695 = vmatprep.subr.mxu1 %v4992_v0 }
 0x2ea   :  { %4649 = vmatmul.mubr.f32.vlgmr.msra.gmra.mxu0 %v1678_v62  ;;  %4696 = vmatpush3.msra.mxu1 %v5051_v4 }
 0x2eb   :  { %4663 = vmatpush3.msra.mxu0 %v5075_v13  ;;  %4096 = vadd.xlane.f32.xlu0 %v4095_v63 }
 0x2ec   :  { %4664 = vmatprep.subr.mxu0 %v4992_v0  ;;  %4697 = vmatprep.subr.mxu1 %v4992_v0 }
 0x2ed   :  { %4665 = vmatpush3.msra.mxu0 %v5080_v15  ;;  %4698 = vmatpush3.msra.mxu1 %v5053_v5 }
 0x2ee   :  { %4666 = vmatprep.subr.mxu0 %v4992_v0  ;;  %4699 = vmatprep.subr.mxu1 %v4992_v0 }
 0x2ef   :  { %4667 = vmatpush3.msra.mxu0 %v5083_v16  ;;  %4700 = vmatpush3.msra.mxu1 %v5055_v6 }
 0x2f0   :  { %4668 = vmatprep.subr.mxu0 %v4992_v0  ;;  %4701 = vmatprep.subr.mxu1 %v4992_v0 }
 0x2f1   :  { %4669 = vmatpush3.msra.mxu0 %v5087_v17  ;;  %4670 = vmatprep.mubr.msk.f32.mxu0 %vm4993_vm1, %v4992_v0 }
 0x2f2   :  { %4702 = vmatpush3.msra.mxu1 %v5070_v10  ;;  %4703 = vmatprep.mubr.msk.f32.mxu1 %vm4993_vm1, %v4992_v0 }
 0x2f3   :  { %4671 = vmatmul.mubr.f32.vlgmr.msra.gmra.mxu0 %v1675_v57  ;;  %4684 = vmatprep.subr.mxu0 %v4992_v0 }
 0x2f4   :  { %4704 = vmatmul.mubr.f32.vlgmr.msra.gmra.mxu1 %v1674_v56  ;;  %4685 = vmatpush3.msra.mxu0 %v5094_v19 }
 0x2f5   :  { %4686 = vmatprep.subr.mxu0 %v4992_v0  ;;  %4692 = vmatprep.mubr.msk.f32.mxu0 %vm4993_vm1, %v4992_v0 }
 0x2f6   :  { %4687 = vmatpush3.msra.mxu0 %v5098_v21  ;;  %4717 = vmatprep.subr.mxu1 %v4992_v0 }
 0x2f7   :  { %4688 = vmatprep.subr.mxu0 %v4992_v0  ;;  %4718 = vmatpush3.msra.mxu1 %v5119_v29 }
 0x2f8   :  { %4689 = vmatpush3.msra.mxu0 %v5101_v22  ;;  %4719 = vmatprep.subr.mxu1 %v4992_v0 }
 0x2f9   :  { %4690 = vmatprep.subr.mxu0 %v4992_v0  ;;  %4720 = vmatpush3.msra.mxu1 %v5121_v31 }
 0x2fa   :  { %4691 = vmatpush3.msra.mxu0 %v5105_v23  ;;  %4721 = vmatprep.subr.mxu1 %v4992_v0 }
 0x2fb   :  { %4693 = vmatmul.mubr.f32.vlgmr.msra.gmra.mxu0 %v1674_v56  ;;  %4722 = vmatpush3.msra.mxu1 %v5127_v34 }
 0x2fc   :  { %4723 = vmatprep.subr.mxu1 %v4992_v0  ;;  %4706 = vmatprep.subr.mxu0 %v4992_v0 }
 0x2fd   :  { %4724 = vmatpush3.msra.mxu1 %v5131_v35  ;;  %4725 = vmatprep.mubr.msk.f32.mxu1 %vm4993_vm1, %v4992_v0 }
 0x2fe   :  { %4739 = vmatprep.subr.mxu1 %v4992_v0  ;;  %4707 = vmatpush3.msra.mxu0 %v5051_v4 }
 0x2ff   :  { %4708 = vmatprep.subr.mxu0 %v4992_v0  ;;  %4714 = vmatprep.mubr.msk.f32.mxu0 %vm4993_vm1, %v4992_v0 }
 0x300   :  { %4709 = vmatpush3.msra.mxu0 %v5053_v5 }
 0x301   :  { %4710 = vmatprep.subr.mxu0 %v4992_v0 }
 0x302   :  { %4711 = vmatpush3.msra.mxu0 %v5055_v6 }
 0x303   :  { %4712 = vmatprep.subr.mxu0 %v4992_v0 }
 0x304   :  { %4713 = vmatpush3.msra.mxu0 %v5070_v10 }
 0x305   :  { %4728 = vmatprep.subr.mxu0 %v4992_v0 }
 0x3a1   :  { %v1771_v1 = vpop.f32.mrf.mxu1 }
 0x3a3   :  { %v4661_v2 = vpop.f32.mrf.mxu1 }
 0x3a9   :  { %v1928_v3 = vpop.f32.mrf.mxu1 }
 0x3aa   :  { %v1680_v7 = vpop.f32.mrf.mxu0 }
 0x3ab   :  { %v4683_v8 = vpop.f32.mrf.mxu1  ;;  %v1772_v12 = vadd.f32 %v1771_v1, %v1680_v7  ;;  %v2094_v1 = vld [vmem:[#allocation2 + $0x20] sm:$0xff] }
 0x3ac   :  { %v4650_v9 = vpop.f32.mrf.mxu0 }
 0x3b3   :  { %v1851_v11 = vpop.f32.mrf.mxu0 }
 0x3b4   :  { %v2086_v37 = vpop.f32.mrf.mxu1  ;;  %v1852_v18 = vadd.f32 %v1851_v11, %v1772_v12 }
 0x3b5   :  { %v4672_v14 = vpop.f32.mrf.mxu0 }
 0x3b6   :  { %v4705_v38 = vpop.f32.mrf.mxu1  ;;  %v1929_v20 = vadd.f32 %v1928_v3, %v1852_v18 }
 0x3bb   :  { %v2011_v25 = vpop.f32.mrf.mxu0 }
 0x3bc   :  { %v2012_v26 = vadd.f32 %v2011_v25, %v1929_v20 }
 0x3bd   :  { %v4694_v27 = vpop.f32.mrf.mxu0 }
 0x3be   :  { %v2087_v28 = vadd.f32 %v2086_v37, %v2012_v26 }
 0x3c0   :  { %v2090_v32 = vadd.f32 %v2087_v28, %v1601_v30 }
 0x3c2   :  { %4981 = vtanh.f32 %v2090_v32 }
 0x3cf   :  { %v4982_v33 = vpop.eup %4981 }
 0x3d0   :  { %2092 = vst.msk [vmem:[#allocation2 + $0x18] sm:$0xff] %vm112_vm0, %v4982_v33  ;;  %v2096_v36 = vsel %vm112_vm0, %v4982_v33, 0 }
 0x3d1   :  { %v2167_v39 = vand.u32 4294901760, %v2096_v36 }
 0x3d3   :  { %v2168_v40 = vsub.f32 %v2096_v36, %v2167_v39  ;;  %4726 = vmatmul.mubr.f32.vlgmr.msra.gmra.mxu1 %v2167_v39 }
 0x3d4   :  { %4740 = vmatpush3.msra.mxu1 %v5051_v4  ;;  %4747 = vmatprep.mubr.msk.f32.mxu1 %vm4993_vm1, %v4992_v0 }
 0x3d5   :  { %4741 = vmatprep.subr.mxu1 %v4992_v0  ;;  %v2169_v41 = vand.u32 4294901760, %v2168_v40 }
 0x3d6   :  { %4742 = vmatpush3.msra.mxu1 %v5053_v5 }
 0x3d7   :  { %4743 = vmatprep.subr.mxu1 %v4992_v0  ;;  %v2170_v42 = vsub.f32 %v2168_v40, %v2169_v41  ;;  %v4069_v43 = vld [vmem:[#allocation2 + $0x18] sm:$0xff] }
 0x3d8   :  { %4744 = vmatpush3.msra.mxu1 %v5055_v6  ;;  %v4084_v44 = vmul.f32 %v5235_v24, %v4069_v43 }
 0x3d9   :  { %4745 = vmatprep.subr.mxu1 %v4992_v0  ;;  %v2171_v45 = vand.u32 4294901760, %v2170_v42 }
 0x3da   :  { %4746 = vmatpush3.msra.mxu1 %v5070_v10  ;;  %v4098_v46 = vsel %vm112_vm0, %v4084_v44, 0.0 }
 0x3db   :  { %4748 = vmatmul.mubr.f32.vlgmr.msra.gmra.mxu1 %v2169_v41  ;;  %4761 = vmatprep.subr.mxu1 %v4992_v0 }
 0x3dc   :  { %4715 = vmatmul.mubr.f32.vlgmr.msra.gmra.mxu0 %v2171_v45  ;;  %4762 = vmatpush3.msra.mxu1 %v5051_v4 }
 0x3dd   :  { %4729 = vmatpush3.msra.mxu0 %v5075_v13  ;;  %4099 = vadd.xlane.f32.xlu0 %v4098_v46 }
 0x3de   :  { %4730 = vmatprep.subr.mxu0 %v4992_v0  ;;  %4763 = vmatprep.subr.mxu1 %v4992_v0 }
 0x3df   :  { %4731 = vmatpush3.msra.mxu0 %v5080_v15  ;;  %4764 = vmatpush3.msra.mxu1 %v5053_v5 }
 0x3e0   :  { %4732 = vmatprep.subr.mxu0 %v4992_v0  ;;  %4765 = vmatprep.subr.mxu1 %v4992_v0 }
 0x3e1   :  { %4733 = vmatpush3.msra.mxu0 %v5083_v16  ;;  %4766 = vmatpush3.msra.mxu1 %v5055_v6 }
 0x3e2   :  { %4734 = vmatprep.subr.mxu0 %v4992_v0  ;;  %4767 = vmatprep.subr.mxu1 %v4992_v0 }
 0x3e3   :  { %4735 = vmatpush3.msra.mxu0 %v5087_v17  ;;  %4736 = vmatprep.mubr.msk.f32.mxu0 %vm4993_vm1, %v4992_v0 }
 0x3e4   :  { %4768 = vmatpush3.msra.mxu1 %v5070_v10  ;;  %4769 = vmatprep.mubr.msk.f32.mxu1 %vm4993_vm1, %v4992_v0 }
 0x3e5   :  { %4737 = vmatmul.mubr.f32.vlgmr.msra.gmra.mxu0 %v2168_v40  ;;  %4750 = vmatprep.subr.mxu0 %v4992_v0 }
 0x3e6   :  { %4770 = vmatmul.mubr.f32.vlgmr.msra.gmra.mxu1 %v2167_v39  ;;  %4751 = vmatpush3.msra.mxu0 %v5094_v19 }
 0x3e7   :  { %4752 = vmatprep.subr.mxu0 %v4992_v0  ;;  %4758 = vmatprep.mubr.msk.f32.mxu0 %vm4993_vm1, %v4992_v0 }
 0x3e8   :  { %4753 = vmatpush3.msra.mxu0 %v5098_v21  ;;  %4783 = vmatprep.subr.mxu1 %v4992_v0 }
 0x3e9   :  { %4754 = vmatprep.subr.mxu0 %v4992_v0  ;;  %4784 = vmatpush3.msra.mxu1 %v5119_v29 }
 0x3ea   :  { %4755 = vmatpush3.msra.mxu0 %v5101_v22  ;;  %4785 = vmatprep.subr.mxu1 %v4992_v0 }
 0x3eb   :  { %4756 = vmatprep.subr.mxu0 %v4992_v0  ;;  %4786 = vmatpush3.msra.mxu1 %v5121_v31 }
 0x3ec   :  { %4757 = vmatpush3.msra.mxu0 %v5105_v23  ;;  %4787 = vmatprep.subr.mxu1 %v4992_v0 }
 0x3ed   :  { %4759 = vmatmul.mubr.f32.vlgmr.msra.gmra.mxu0 %v2167_v39  ;;  %4788 = vmatpush3.msra.mxu1 %v5127_v34 }
 0x3ee   :  { %4789 = vmatprep.subr.mxu1 %v4992_v0  ;;  %4772 = vmatprep.subr.mxu0 %v4992_v0 }
 0x3ef   :  { %4790 = vmatpush3.msra.mxu1 %v5131_v35  ;;  %4791 = vmatprep.mubr.msk.f32.mxu1 %vm4993_vm1, %v4992_v0 }
 0x3f0   :  { %4805 = vmatprep.subr.mxu1 %v4992_v0  ;;  %4773 = vmatpush3.msra.mxu0 %v5051_v4 }
 0x3f1   :  { %4774 = vmatprep.subr.mxu0 %v4992_v0  ;;  %4780 = vmatprep.mubr.msk.f32.mxu0 %vm4993_vm1, %v4992_v0 }
 0x3f2   :  { %4775 = vmatpush3.msra.mxu0 %v5053_v5 }
 0x3f3   :  { %4776 = vmatprep.subr.mxu0 %v4992_v0 }
 0x3f4   :  { %4777 = vmatpush3.msra.mxu0 %v5055_v6 }
 0x3f5   :  { %4778 = vmatprep.subr.mxu0 %v4992_v0 }
 0x3f6   :  { %4779 = vmatpush3.msra.mxu0 %v5070_v10 }
 0x3f7   :  { %4794 = vmatprep.subr.mxu0 %v4992_v0 }
 0x493   :  { %v2264_v47 = vpop.f32.mrf.mxu1 }
 0x495   :  { %v4727_v48 = vpop.f32.mrf.mxu1 }
 0x49b   :  { %v2421_v49 = vpop.f32.mrf.mxu1 }
 0x49c   :  { %v2173_v50 = vpop.f32.mrf.mxu0 }
 0x49d   :  { %v4749_v51 = vpop.f32.mrf.mxu1  ;;  %v2265_v54 = vadd.f32 %v2264_v47, %v2173_v50  ;;  %v2587_v47 = vld [vmem:[#allocation2 + $0x28] sm:$0xff] }
 0x49e   :  { %v4716_v52 = vpop.f32.mrf.mxu0 }
 0x4a5   :  { %v2344_v53 = vpop.f32.mrf.mxu0 }
 0x4a6   :  { %v2579_v55 = vpop.f32.mrf.mxu1  ;;  %v2345_v57 = vadd.f32 %v2344_v53, %v2265_v54 }
 0x4a7   :  { %v4738_v56 = vpop.f32.mrf.mxu0 }
 0x4a8   :  { %v4771_v58 = vpop.f32.mrf.mxu1  ;;  %v2422_v59 = vadd.f32 %v2421_v49, %v2345_v57 }
 0x4ad   :  { %v2504_v60 = vpop.f32.mrf.mxu0 }
 0x4ae   :  { %v2505_v61 = vadd.f32 %v2504_v60, %v2422_v59 }
 0x4af   :  { %v4760_v62 = vpop.f32.mrf.mxu0 }
 0x4b0   :  { %v2580_v63 = vadd.f32 %v2579_v55, %v2505_v61 }
 0x4b2   :  { %v2583_v2 = vadd.f32 %v2580_v63, %v2094_v1 }
 0x4b4   :  { %4983 = vtanh.f32 %v2583_v2 }
 0x4c1   :  { %v4984_v3 = vpop.eup %4983 }
 0x4c2   :  { %2585 = vst.msk [vmem:[#allocation2 + $0x20] sm:$0xff] %vm112_vm0, %v4984_v3  ;;  %v2589_v7 = vsel %vm112_vm0, %v4984_v3, 0 }
 0x4c3   :  { %v2660_v8 = vand.u32 4294901760, %v2589_v7 }
 0x4c5   :  { %v2661_v9 = vsub.f32 %v2589_v7, %v2660_v8  ;;  %4792 = vmatmul.mubr.f32.vlgmr.msra.gmra.mxu1 %v2660_v8 }
 0x4c6   :  { %4806 = vmatpush3.msra.mxu1 %v5051_v4  ;;  %4813 = vmatprep.mubr.msk.f32.mxu1 %vm4993_vm1, %v4992_v0 }
 0x4c7   :  { %4807 = vmatprep.subr.mxu1 %v4992_v0  ;;  %v2662_v11 = vand.u32 4294901760, %v2661_v9 }
 0x4c8   :  { %4808 = vmatpush3.msra.mxu1 %v5053_v5 }
 0x4c9   :  { %4809 = vmatprep.subr.mxu1 %v4992_v0  ;;  %v2663_v12 = vsub.f32 %v2661_v9, %v2662_v11  ;;  %v4070_v37 = vld [vmem:[#allocation2 + $0x20] sm:$0xff] }
 0x4ca   :  { %4810 = vmatpush3.msra.mxu1 %v5055_v6  ;;  %v4085_v14 = vmul.f32 %v5235_v24, %v4070_v37  ;;  %v3080_v37 = vld [vmem:[#allocation2 + $0x30] sm:$0xff] }
 0x4cb   :  { %4811 = vmatprep.subr.mxu1 %v4992_v0  ;;  %v2664_v18 = vand.u32 4294901760, %v2663_v12 }
 0x4cc   :  { %4812 = vmatpush3.msra.mxu1 %v5070_v10  ;;  %v4101_v38 = vsel %vm112_vm0, %v4085_v14, 0.0 }
 0x4cd   :  { %4814 = vmatmul.mubr.f32.vlgmr.msra.gmra.mxu1 %v2662_v11  ;;  %4827 = vmatprep.subr.mxu1 %v4992_v0 }
 0x4ce   :  { %4781 = vmatmul.mubr.f32.vlgmr.msra.gmra.mxu0 %v2664_v18  ;;  %4828 = vmatpush3.msra.mxu1 %v5051_v4 }
 0x4cf   :  { %4795 = vmatpush3.msra.mxu0 %v5075_v13  ;;  %4102 = vadd.xlane.f32.xlu1 %v4101_v38 }
 0x4d0   :  { %4796 = vmatprep.subr.mxu0 %v4992_v0  ;;  %4829 = vmatprep.subr.mxu1 %v4992_v0 }
 0x4d1   :  { %4797 = vmatpush3.msra.mxu0 %v5080_v15  ;;  %4830 = vmatpush3.msra.mxu1 %v5053_v5 }
 0x4d2   :  { %4798 = vmatprep.subr.mxu0 %v4992_v0  ;;  %4831 = vmatprep.subr.mxu1 %v4992_v0 }
 0x4d3   :  { %4799 = vmatpush3.msra.mxu0 %v5083_v16  ;;  %4832 = vmatpush3.msra.mxu1 %v5055_v6 }
 0x4d4   :  { %4800 = vmatprep.subr.mxu0 %v4992_v0  ;;  %4833 = vmatprep.subr.mxu1 %v4992_v0 }
 0x4d5   :  { %4801 = vmatpush3.msra.mxu0 %v5087_v17  ;;  %4802 = vmatprep.mubr.msk.f32.mxu0 %vm4993_vm1, %v4992_v0 }
 0x4d6   :  { %4834 = vmatpush3.msra.mxu1 %v5070_v10  ;;  %4835 = vmatprep.mubr.msk.f32.mxu1 %vm4993_vm1, %v4992_v0 }
 0x4d7   :  { %4803 = vmatmul.mubr.f32.vlgmr.msra.gmra.mxu0 %v2661_v9  ;;  %4816 = vmatprep.subr.mxu0 %v4992_v0 }
 0x4d8   :  { %4836 = vmatmul.mubr.f32.vlgmr.msra.gmra.mxu1 %v2660_v8  ;;  %4817 = vmatpush3.msra.mxu0 %v5094_v19 }
 0x4d9   :  { %4818 = vmatprep.subr.mxu0 %v4992_v0  ;;  %4824 = vmatprep.mubr.msk.f32.mxu0 %vm4993_vm1, %v4992_v0 }
 0x4da   :  { %4819 = vmatpush3.msra.mxu0 %v5098_v21  ;;  %4849 = vmatprep.subr.mxu1 %v4992_v0 }
 0x4db   :  { %4820 = vmatprep.subr.mxu0 %v4992_v0  ;;  %4850 = vmatpush3.msra.mxu1 %v5119_v29 }
 0x4dc   :  { %4821 = vmatpush3.msra.mxu0 %v5101_v22  ;;  %4851 = vmatprep.subr.mxu1 %v4992_v0 }
 0x4dd   :  { %4822 = vmatprep.subr.mxu0 %v4992_v0  ;;  %4852 = vmatpush3.msra.mxu1 %v5121_v31 }
 0x4de   :  { %4823 = vmatpush3.msra.mxu0 %v5105_v23  ;;  %4853 = vmatprep.subr.mxu1 %v4992_v0 }
 0x4df   :  { %4825 = vmatmul.mubr.f32.vlgmr.msra.gmra.mxu0 %v2660_v8  ;;  %4854 = vmatpush3.msra.mxu1 %v5127_v34 }
 0x4e0   :  { %4855 = vmatprep.subr.mxu1 %v4992_v0  ;;  %4838 = vmatprep.subr.mxu0 %v4992_v0 }
 0x4e1   :  { %4856 = vmatpush3.msra.mxu1 %v5131_v35  ;;  %4857 = vmatprep.mubr.msk.f32.mxu1 %vm4993_vm1, %v4992_v0 }
 0x4e2   :  { %4871 = vmatprep.subr.mxu1 %v4992_v0  ;;  %4839 = vmatpush3.msra.mxu0 %v5051_v4 }
 0x4e3   :  { %4840 = vmatprep.subr.mxu0 %v4992_v0  ;;  %4846 = vmatprep.mubr.msk.f32.mxu0 %vm4993_vm1, %v4992_v0 }
 0x4e4   :  { %4841 = vmatpush3.msra.mxu0 %v5053_v5 }
 0x4e5   :  { %4842 = vmatprep.subr.mxu0 %v4992_v0 }
 0x4e6   :  { %4843 = vmatpush3.msra.mxu0 %v5055_v6 }
 0x4e7   :  { %4844 = vmatprep.subr.mxu0 %v4992_v0 }
 0x4e8   :  { %4845 = vmatpush3.msra.mxu0 %v5070_v10 }
 0x4e9   :  { %4860 = vmatprep.subr.mxu0 %v4992_v0 }
 0x585   :  { %v2757_v20 = vpop.f32.mrf.mxu1 }
 0x587   :  { %v4793_v25 = vpop.f32.mrf.mxu1 }
 0x58d   :  { %v2914_v26 = vpop.f32.mrf.mxu1 }
 0x58e   :  { %v2666_v27 = vpop.f32.mrf.mxu0 }
 0x58f   :  { %v4815_v28 = vpop.f32.mrf.mxu1  ;;  %v2758_v33 = vadd.f32 %v2757_v20, %v2666_v27 }
 0x590   :  { %v4782_v30 = vpop.f32.mrf.mxu0 }
 0x591   :  { %v5654_v30 = vld [vmem:[%s5704_s5] ss:$0 sm:$0xff] }
 0x597   :  { %v2837_v32 = vpop.f32.mrf.mxu0 }
 0x598   :  { %v3072_v36 = vpop.f32.mrf.mxu1  ;;  %v2838_v40 = vadd.f32 %v2837_v32, %v2758_v33 }
 0x599   :  { %v4804_v39 = vpop.f32.mrf.mxu0 }
 0x59a   :  { %v4837_v41 = vpop.f32.mrf.mxu1  ;;  %v2915_v42 = vadd.f32 %v2914_v26, %v2838_v40 }
 0x59f   :  { %v2997_v43 = vpop.f32.mrf.mxu0 }
 0x5a0   :  { %v2998_v44 = vadd.f32 %v2997_v43, %v2915_v42 }
 0x5a1   :  { %v4826_v45 = vpop.f32.mrf.mxu0 }
 0x5a2   :  { %v3073_v46 = vadd.f32 %v3072_v36, %v2998_v44 }
 0x5a4   :  { %v3076_v48 = vadd.f32 %v3073_v46, %v2587_v47 }
 0x5a6   :  { %4985 = vtanh.f32 %v3076_v48 }
 0x5b3   :  { %v4986_v49 = vpop.eup %4985 }
 0x5b4   :  { %3078 = vst.msk [vmem:[#allocation2 + $0x28] sm:$0xff] %vm112_vm0, %v4986_v49  ;;  %v3082_v50 = vsel %vm112_vm0, %v4986_v49, 0 }
 0x5b5   :  { %v3153_v51 = vand.u32 4294901760, %v3082_v50 }
 0x5b7   :  { %v3154_v52 = vsub.f32 %v3082_v50, %v3153_v51  ;;  %4858 = vmatmul.mubr.f32.vlgmr.msra.gmra.mxu1 %v3153_v51  ;;  %v4094_v50 = vpop.xlane.xlu1 %4093 }
 0x5b8   :  { %4872 = vmatpush3.msra.mxu1 %v5051_v4  ;;  %4879 = vmatprep.mubr.msk.f32.mxu1 %vm4993_vm1, %v4992_v0 }
 0x5b9   :  { %4873 = vmatprep.subr.mxu1 %v4992_v0  ;;  %v3155_v53 = vand.u32 4294901760, %v3154_v52 }
 0x5ba   :  { %4874 = vmatpush3.msra.mxu1 %v5053_v5 }
 0x5bb   :  { %4875 = vmatprep.subr.mxu1 %v4992_v0  ;;  %v3156_v54 = vsub.f32 %v3154_v52, %v3155_v53  ;;  %v4071_v55 = vld [vmem:[#allocation2 + $0x28] sm:$0xff] }
 0x5bc   :  { %4876 = vmatpush3.msra.mxu1 %v5055_v6  ;;  %v4086_v56 = vmul.f32 %v5235_v24, %v4071_v55 }
 0x5bd   :  { %4877 = vmatprep.subr.mxu1 %v4992_v0  ;;  %v3157_v57 = vand.u32 4294901760, %v3156_v54 }
 0x5be   :  { %4878 = vmatpush3.msra.mxu1 %v5070_v10  ;;  %v4104_v58 = vsel %vm112_vm0, %v4086_v56, 0.0 }
 0x5bf   :  { %4880 = vmatmul.mubr.f32.vlgmr.msra.gmra.mxu1 %v3155_v53  ;;  %4893 = vmatprep.subr.mxu1 %v4992_v0  ;;  %v4139_v53 = vlaneseq }
 0x5c0   :  { %4847 = vmatmul.mubr.f32.vlgmr.msra.gmra.mxu0 %v3157_v57  ;;  %4894 = vmatpush3.msra.mxu1 %v5051_v4  ;;  %v4091_v57 = vpop.xlane.xlu0 %4090 }
 0x5c1   :  { %4861 = vmatpush3.msra.mxu0 %v5075_v13  ;;  %4105 = vadd.xlane.f32.xlu0 %v4104_v58  ;;  %v4140_v54 = vand.u32 127, %v4139_v53  ;;  %v4142_v55 = vshrl.u32 %v4139_v53, 7 }
 0x5c2   :  { %4862 = vmatprep.subr.mxu0 %v4992_v0  ;;  %4895 = vmatprep.subr.mxu1 %v4992_v0 }
 0x5c3   :  { %4863 = vmatpush3.msra.mxu0 %v5080_v15  ;;  %4896 = vmatpush3.msra.mxu1 %v5053_v5  ;;  %v4143_v58 = vsub.s32 %v4140_v54, %v4142_v55 }
 0x5c4   :  { %4864 = vmatprep.subr.mxu0 %v4992_v0  ;;  %4897 = vmatprep.subr.mxu1 %v4992_v0 }
 0x5c5   :  { %4865 = vmatpush3.msra.mxu0 %v5083_v16  ;;  %4898 = vmatpush3.msra.mxu1 %v5055_v6 }
 0x5c6   :  { %4866 = vmatprep.subr.mxu0 %v4992_v0  ;;  %4899 = vmatprep.subr.mxu1 %v4992_v0 }
 0x5c7   :  { %4867 = vmatpush3.msra.mxu0 %v5087_v17  ;;  %4868 = vmatprep.mubr.msk.f32.mxu0 %vm4993_vm1, %v4992_v0 }
 0x5c8   :  { %4900 = vmatpush3.msra.mxu1 %v5070_v10  ;;  %4901 = vmatprep.mubr.msk.f32.mxu1 %vm4993_vm1, %v4992_v0 }
 0x5c9   :  { %4869 = vmatmul.mubr.f32.vlgmr.msra.gmra.mxu0 %v3154_v52  ;;  %4882 = vmatprep.subr.mxu0 %v4992_v0 }
 0x5ca   :  { %4902 = vmatmul.mubr.f32.vlgmr.msra.gmra.mxu1 %v3153_v51  ;;  %4883 = vmatpush3.msra.mxu0 %v5094_v19 }
 0x5cb   :  { %4884 = vmatprep.subr.mxu0 %v4992_v0  ;;  %4890 = vmatprep.mubr.msk.f32.mxu0 %vm4993_vm1, %v4992_v0 }
 0x5cc   :  { %4885 = vmatpush3.msra.mxu0 %v5098_v21  ;;  %4915 = vmatprep.subr.mxu1 %v4992_v0 }
 0x5cd   :  { %4886 = vmatprep.subr.mxu0 %v4992_v0  ;;  %4916 = vmatpush3.msra.mxu1 %v5119_v29  ;;  %v14_v29 = vstv %s5705_s6 }
 0x5ce   :  { %4887 = vmatpush3.msra.mxu0 %v5101_v22  ;;  %4917 = vmatprep.subr.mxu1 %v4992_v0  ;;  %15 = vst [vmem:[#allocation3] sm:$0x1] %v14_v29 }
 0x5cf   :  { %4888 = vmatprep.subr.mxu0 %v4992_v0  ;;  %4918 = vmatpush3.msra.mxu1 %v5121_v31 }
 0x5d0   :  { %4889 = vmatpush3.msra.mxu0 %v5105_v23  ;;  %4919 = vmatprep.subr.mxu1 %v4992_v0 }
 0x5d1   :  { %4891 = vmatmul.mubr.f32.vlgmr.msra.gmra.mxu0 %v3153_v51  ;;  %4920 = vmatpush3.msra.mxu1 %v5127_v34  ;;  %v4103_v51 = vpop.xlane.xlu1 %4102 }
 0x5d2   :  { %4921 = vmatprep.subr.mxu1 %v4992_v0  ;;  %4904 = vmatprep.subr.mxu0 %v4992_v0 }
 0x5d3   :  { %4922 = vmatpush3.msra.mxu1 %v5131_v35  ;;  %4923 = vmatprep.mubr.msk.f32.mxu1 %vm4993_vm1, %v4992_v0 }
 0x5d4   :  { %4937 = vmatprep.subr.mxu1 %v4992_v0  ;;  %4905 = vmatpush3.msra.mxu0 %v5051_v4 }
 0x5d5   :  { %4906 = vmatprep.subr.mxu0 %v4992_v0  ;;  %4912 = vmatprep.mubr.msk.f32.mxu0 %vm4993_vm1, %v4992_v0 }
 0x5d6   :  { %4907 = vmatpush3.msra.mxu0 %v5053_v5 }
 0x5d7   :  { %4908 = vmatprep.subr.mxu0 %v4992_v0 }
 0x5d8   :  { %4909 = vmatpush3.msra.mxu0 %v5055_v6 }
 0x5d9   :  { %4910 = vmatprep.subr.mxu0 %v4992_v0 }
 0x5da   :  { %4911 = vmatpush3.msra.mxu0 %v5070_v10 }
 0x5db   :  { %4926 = vmatprep.subr.mxu0 %v4992_v0 }
 0x677   :  { %v3250_v31 = vpop.f32.mrf.mxu1 }
 0x679   :  { %v4859_v34 = vpop.f32.mrf.mxu1 }
 0x67a   :  { %v4097_v34 = vpop.xlane.xlu0 %4096 }
 0x67f   :  { %v3407_v35 = vpop.f32.mrf.mxu1 }
 0x680   :  { %v3159_v24 = vpop.f32.mrf.mxu0 }
 0x681   :  { %v4881_v59 = vpop.f32.mrf.mxu1  ;;  %v3251_v62 = vadd.f32 %v3250_v31, %v3159_v24 }
 0x682   :  { %v4848_v60 = vpop.f32.mrf.mxu0 }
 0x683   :  { %v4100_v60 = vpop.xlane.xlu0 %4099 }
 0x689   :  { %v3330_v61 = vpop.f32.mrf.mxu0 }
 0x68a   :  { %v3565_v63 = vpop.f32.mrf.mxu1  ;;  %v3331_v2 = vadd.f32 %v3330_v61, %v3251_v62 }
 0x68b   :  { %v4870_v1 = vpop.f32.mrf.mxu0 }
 0x68c   :  { %v4903_v3 = vpop.f32.mrf.mxu1  ;;  %v3408_v7 = vadd.f32 %v3407_v35, %v3331_v2 }
 0x691   :  { %v3490_v8 = vpop.f32.mrf.mxu0 }
 0x692   :  { %v3491_v9 = vadd.f32 %v3490_v8, %v3408_v7  ;;  %v4106_v7 = vpop.xlane.xlu0 %4105 }
 0x693   :  { %v4892_v11 = vpop.f32.mrf.mxu0 }
 0x694   :  { %v3566_v12 = vadd.f32 %v3565_v63, %v3491_v9 }
 0x696   :  { %v3569_v14 = vadd.f32 %v3566_v12, %v3080_v37 }
 0x698   :  { %4987 = vtanh.f32 %v3569_v14 }
 0x6a5   :  { %v4988_v18 = vpop.eup %4987 }
 0x6a6   :  { %3571 = vst.msk [vmem:[#allocation2 + $0x30] sm:$0xff] %vm112_vm0, %v4988_v18  ;;  %v3575_v38 = vsel %vm112_vm0, %v4988_v18, 0 }
 0x6a7   :  { %v3646_v20 = vand.u32 4294901760, %v3575_v38 }
 0x6a9   :  { %v3647_v25 = vsub.f32 %v3575_v38, %v3646_v20  ;;  %4924 = vmatmul.mubr.f32.vlgmr.msra.gmra.mxu1 %v3646_v20 }
 0x6aa   :  { %4938 = vmatpush3.msra.mxu1 %v5051_v4  ;;  %4945 = vmatprep.mubr.msk.f32.mxu1 %vm4993_vm1, %v4992_v0 }
 0x6ab   :  { %4939 = vmatprep.subr.mxu1 %v4992_v0  ;;  %v3648_v26 = vand.u32 4294901760, %v3647_v25 }
 0x6ac   :  { %4940 = vmatpush3.msra.mxu1 %v5053_v5 }
 0x6ad   :  { %4941 = vmatprep.subr.mxu1 %v4992_v0  ;;  %v3649_v27 = vsub.f32 %v3647_v25, %v3648_v26  ;;  %v4072_v28 = vld [vmem:[#allocation2 + $0x30] sm:$0xff] }
 0x6ae   :  { %4942 = vmatpush3.msra.mxu1 %v5055_v6  ;;  %v4087_v32 = vmul.f32 %v5654_v30, %v4072_v28 }
 0x6af   :  { %4943 = vmatprep.subr.mxu1 %v4992_v0  ;;  %v3650_v33 = vand.u32 4294901760, %v3649_v27 }
 0x6b0   :  { %4944 = vmatpush3.msra.mxu1 %v5070_v10  ;;  %v4107_v36 = vsel %vm112_vm0, %v4087_v32, 0.0 }
 0x6b1   :  { %4946 = vmatmul.mubr.f32.vlgmr.msra.gmra.mxu1 %v3648_v26  ;;  %4959 = vmatprep.subr.mxu1 %v4992_v0 }
 0x6b2   :  { %4913 = vmatmul.mubr.f32.vlgmr.msra.gmra.mxu0 %v3650_v33  ;;  %4960 = vmatpush3.msra.mxu1 %v5051_v4  ;;  %v4201_v4 = vld [vmem:[#allocation3] ss:$0 sm:$0xff] }
 0x6b3   :  { %4927 = vmatpush3.msra.mxu0 %v5075_v13  ;;  %4108 = vadd.xlane.f32.xlu1 %v4107_v36 }
 0x6b4   :  { %4928 = vmatprep.subr.mxu0 %v4992_v0  ;;  %4961 = vmatprep.subr.mxu1 %v4992_v0 }
 0x6b5   :  { %4929 = vmatpush3.msra.mxu0 %v5080_v15  ;;  %4962 = vmatpush3.msra.mxu1 %v5053_v5 }
 0x6b6   :  { %4930 = vmatprep.subr.mxu0 %v4992_v0  ;;  %4963 = vmatprep.subr.mxu1 %v4992_v0 }
 0x6b7   :  { %4931 = vmatpush3.msra.mxu0 %v5083_v16  ;;  %4964 = vmatpush3.msra.mxu1 %v5055_v6 }
 0x6b8   :  { %4932 = vmatprep.subr.mxu0 %v4992_v0  ;;  %4965 = vmatprep.subr.mxu1 %v4992_v0 }
 0x6b9   :  { %4933 = vmatpush3.msra.mxu0 %v5087_v17  ;;  %4934 = vmatprep.mubr.msk.f32.mxu0 %vm4993_vm1, %v4992_v0 }
 0x6ba   :  { %4966 = vmatpush3.msra.mxu1 %v5070_v10  ;;  %4967 = vmatprep.mubr.msk.f32.mxu1 %vm4993_vm1, %v4992_v0 }
 0x6bb   :  { %4935 = vmatmul.mubr.f32.vlgmr.msra.gmra.mxu0 %v3647_v25  ;;  %4948 = vmatprep.subr.mxu0 %v4992_v0 }
 0x6bc   :  { %4968 = vmatmul.mubr.f32.vlgmr.msra.gmra.mxu1 %v3646_v20  ;;  %4949 = vmatpush3.msra.mxu0 %v5094_v19 }
 0x6bd   :  { %4950 = vmatprep.subr.mxu0 %v4992_v0  ;;  %4956 = vmatprep.mubr.msk.f32.mxu0 %vm4993_vm1, %v4992_v0 }
 0x6be   :  { %4951 = vmatpush3.msra.mxu0 %v5098_v21 }
 0x6bf   :  { %4952 = vmatprep.subr.mxu0 %v4992_v0 }
 0x6c0   :  { %4953 = vmatpush3.msra.mxu0 %v5101_v22 }
 0x6c1   :  { %4954 = vmatprep.subr.mxu0 %v4992_v0 }
 0x6c2   :  { %4955 = vmatpush3.msra.mxu0 %v5105_v23  ;;  %v3573_v23 = vld [vmem:[#allocation2 + $0x38] sm:$0xff] }
 0x6c3   :  { %4957 = vmatmul.mubr.f32.vlgmr.msra.gmra.mxu0 %v3646_v20 }
 0x6c4   :  { %4120 = vperm.xlu1 %4974, %v4201_v4  }
 0x73c   :  { %v4109_v52 = vpop.xlane.xlu1 %4108 }
 0x740   :  { %v4121_v56 = vpop.permute.xlu1 %4120 }
 0x741   :  { %v4123_v29 = vadd.f32 %v4121_v56, %v4091_v57  ;;  %v4124_v31 = vadd.f32 %v4121_v56, %v4094_v50  ;;  %v4125_v35 = vadd.f32 %v4121_v56, %v4097_v34  ;;  %v4126_v62 = vadd.f32 %v4121_v56, %v4100_v60 }
 0x742   :  { %v4127_v1 = vadd.f32 %v4121_v56, %v4103_v51  ;;  %v4128_v8 = vadd.f32 %v4121_v56, %v4106_v7  ;;  %v4129_v12 = vadd.f32 %v4121_v56, %v4109_v52 }
 0x743   :  { %v4144_v24 = vrot.slane %v4123_v29, %v4143_v58  ;;  %v4148_v59 = vrot.slane %v4124_v31, %v4143_v58  ;;  %v4152_v61 = vrot.slane %v4125_v35, %v4143_v58  ;;  %v4156_v3 = vrot.slane %v4126_v62, %v4143_v58 }
 0x744   :  { %v4160_v11 = vrot.slane %v4127_v1, %v4143_v58  ;;  %v4164_v14 = vrot.slane %v4128_v8, %v4143_v58  ;;  %v4168_v25 = vrot.slane %v4129_v12, %v4143_v58 }
 0x745   :  { %v4174_v63 = vsel %vm4173_vm2, %v4148_v59, %v4144_v24 }
 0x746   :  { %v4176_v2 = vsel %vm4175_vm3, %v4152_v61, %v4174_v63 }
 0x747   :  { %v4178_v9 = vsel %vm4177_vm4, %v4156_v3, %v4176_v2 }
 0x748   :  { %v4180_v37 = vsel %vm4179_vm5, %v4160_v11, %v4178_v9 }
 0x749   :  { %v4182_v38 = vsel %vm4181_vm6, %v4164_v14, %v4180_v37 }
 0x74a   :  { %v4184_v27 = vsel %vm4183_vm7, %v4168_v25, %v4182_v38 }
 0x769   :  { %v3743_v5 = vpop.f32.mrf.mxu1 }
 0x76b   :  { %v4925_v6 = vpop.f32.mrf.mxu1 }
 0x771   :  { %v3900_v10 = vpop.f32.mrf.mxu1 }
 0x772   :  { %v3652_v13 = vpop.f32.mrf.mxu0 }
 0x773   :  { %v4947_v15 = vpop.f32.mrf.mxu1  ;;  %v3744_v19 = vadd.f32 %v3743_v5, %v3652_v13 }
 0x774   :  { %v4914_v16 = vpop.f32.mrf.mxu0 }
 0x77b   :  { %v3823_v17 = vpop.f32.mrf.mxu0 }
 0x77c   :  { %v4058_v21 = vpop.f32.mrf.mxu1  ;;  %v3824_v40 = vadd.f32 %v3823_v17, %v3744_v19 }
 0x77d   :  { %v4936_v39 = vpop.f32.mrf.mxu0 }
 0x77e   :  { %v4969_v41 = vpop.f32.mrf.mxu1  ;;  %v3901_v22 = vadd.f32 %v3900_v10, %v3824_v40 }
 0x783   :  { %v3983_v42 = vpop.f32.mrf.mxu0 }
 0x784   :  { %v3984_v0 = vadd.f32 %v3983_v42, %v3901_v22 }
 0x785   :  { %v4958_v43 = vpop.f32.mrf.mxu0 }
 0x786   :  { %v4059_v44 = vadd.f32 %v4058_v21, %v3984_v0 }
 0x788   :  { %v4062_v45 = vadd.f32 %v4059_v44, %v3573_v23 }
 0x78a   :  { %4989 = vtanh.f32 %v4062_v45 }
 0x797   :  { %v4990_v46 = vpop.eup %4989 }
 0x798   :  { %4064 = vst.msk [vmem:[#allocation2 + $0x38] sm:$0xff] %vm112_vm0, %v4990_v46  ;;  %4065 = vst.msk [vmem:[%s5706_s8] sm:$0xff] %vm112_vm0, %v4990_v46 }
 0x79f   :  { %v4073_v47 = vld [vmem:[#allocation2 + $0x38] sm:$0xff] }
 0x7a0   :  { %v4088_v48 = vmul.f32 %v5654_v30, %v4073_v47 }
 0x7a2   :  { %v4110_v49 = vsel %vm112_vm0, %v4088_v48, 0.0 }
 0x7a3   :  { %4111 = vadd.xlane.f32.xlu0 %v4110_v49 }
 0x82c   :  { %v4112_v18 = vpop.xlane.xlu0 %4111 }
 0x82d   :  { %v4130_v20 = vadd.f32 %v4121_v56, %v4112_v18 }
 0x82f   :  { %v4172_v26 = vrot.slane %v4130_v20, %v4143_v58 }
 0x831   :  { %v4186_v28 = vsel %vm4185_vm8, %v4172_v26, %v4184_v27 }
 0x832   :  { %4189 = vst.msk [vmem:[%s5707_s7] sm:$0xff] %vm4188_vm9, %v4186_v28 }

</bundles_post_ra>
